<compile_context>
chip_gen: v6e
topology: v6e:2x2x1
jax: 0.10.0
libtpu: 0.0.40
codegen_flags: <defaults>
</compile_context>

<pallas_src>
import functools

import numpy as np
import jax
import jax.numpy as jnp
from jax.experimental import pallas as pl
from jax.experimental.pallas import tpu as pltpu

EPS = 1e-6


# ----------------------------------------------------------------------------
# Pallas kernel
# ----------------------------------------------------------------------------
def _pairwise_iou(b, bt):
    """IoU (mmdet '+1' convention).

    b : (R, 4) row-major boxes   -> column operands (sublane axis)
    bt: (4, C) coord-major boxes -> row operands (lane axis)
    returns (R, C).

    NOTE: with identical argument sets this formula is exactly symmetric in FP
    (min/max/mul/add commute), which the kernel relies on when it reads
    iou[t, rep] in place of the reference's iou[rep, t].
    """
    x1c, y1c, x2c, y2c = b[:, 0:1], b[:, 1:2], b[:, 2:3], b[:, 3:4]      # (R, 1)
    x1r, y1r, x2r, y2r = bt[0:1, :], bt[1:2, :], bt[2:3, :], bt[3:4, :]  # (1, C)
    w = jnp.maximum(jnp.minimum(x2c, x2r) - jnp.maximum(x1c, x1r) + 1.0, 0.0)
    h = jnp.maximum(jnp.minimum(y2c, y2r) - jnp.maximum(y1c, y1r) + 1.0, 0.0)
    ov = w * h
    area_c = (x2c - x1c + 1.0) * (y2c - y1c + 1.0)
    area_r = (x2r - x1r + 1.0) * (y2r - y1r + 1.0)
    # exact divide on purpose: an approximate reciprocal could flip iou>thr tests
    return ov / (area_c + area_r - ov)


def _nms_loss_kernel(nvalid_ref, gtind_sm_ref,
                     pbox_ref, pboxt_ref, gboxt_ref, gtbox_ref, scores_ref, gtind_ref,
                     out_ref,
                     iou_s, gp_s, alive_s, pull_s, push_s, pullcnt_s, pushcnt_s, rep_s, *,
                     nms_thr, use_score, pull_relax, push_relax):
    img = pl.program_id(0)
    nvalid = nvalid_ref[img]
    m_pad = iou_s.shape[1]
    g_pad = rep_s.shape[0]

    # ---- per-image one-time setup (O(M^2), done once) -----------------------------
    # Padded (zero) proposals have IoU 1.0 with each other under the '+1' convention;
    # every use below is gated by the alive mask (initialized to col < nvalid), so
    # padded lanes can never leak into the loss.  Keep it that way.
    iou_s[...] = _pairwise_iou(pbox_ref[...], pboxt_ref[...])      # proposal-proposal IoU
    # GT -> proposal IoU: gp_s[g, j] == IoU(gt_box[g], assigned_gt_box[j])
    #                              == gt_iou[g, gt_index[j]] of the reference.
    gp_s[...] = _pairwise_iou(gtbox_ref[...], gboxt_ref[...])

    scores = scores_ref[...]                        # (1, M) f32, descending-sorted
    gtind = gtind_ref[...]                          # (1, M) i32
    col = jax.lax.broadcasted_iota(jnp.int32, (1, m_pad), 1)
    thr = jnp.float32(nms_thr)

    alive_s[...] = (col < nvalid).astype(jnp.int32)
    pull_s[...] = jnp.zeros_like(pull_s)
    push_s[...] = jnp.zeros_like(push_s)
    pullcnt_s[...] = jnp.zeros_like(pullcnt_s)
    pushcnt_s[...] = jnp.zeros_like(pushcnt_s)
    for g in range(g_pad):                          # tiny static unroll
        rep_s[g] = jnp.int32(-1)                    # -1 == "no representative yet"

    # ---- branchless sequential NMS walk over host-presorted candidates ------------
    @pl.loop(0, nvalid)
    def _(t):
        # scalar bookkeeping (SMEM)
        i_gt = gtind_sm_ref[img, t]
        rep = rep_s[i_gt]
        has_rep = rep >= 0

        # vector state / rows
        alive_vec = alive_s[...]                                   # (1, M) i32
        alive_b = alive_vec > 0
        sel_t = col == t
        alive_after = jnp.logical_and(alive_b, jnp.logical_not(sel_t))
        iou_row = iou_s[pl.ds(t, 1), :]                            # (1, M) dyn slice
        gtiou_row = gp_s[pl.ds(i_gt, 1), :]                        # (1, M) dyn slice

        overlap = jnp.logical_and(alive_after, iou_row > thr)
        m2 = jnp.logical_and(jnp.logical_and(overlap, gtind != i_gt),
                             iou_row > gtiou_row)

        # Four INDEPENDENT cross-lane reduces (no data dependence between them, so
        # their XLU latencies overlap) -- replaces v1's six serialized reduce+extract
        # chains plus a reduce->branch sync.
        alive_t = jnp.sum(jnp.where(sel_t, alive_vec, 0)) > 0       # candidate still in idx
        remaining = jnp.sum(alive_after.astype(jnp.int32))          # |idx| after popping t
        cnt2 = jnp.sum(m2.astype(jnp.int32))                        # push pair count
        s_i = jnp.sum(jnp.where(sel_t, scores, 0.0))                # score of candidate t

        # -------- pull loss (vector-accumulated, reduced once after the loop) ------
        if pull_relax:
            pull_vec = -jnp.log(1.0 - thr + jnp.maximum(iou_row, EPS))
        else:
            pull_vec = -jnp.log(jnp.maximum(iou_row, EPS))
        # Bug-compatible with the reference: the pull VALUE is dropped when no other
        # candidates remain (the `break`), but pull_cnt is still incremented below.
        pull_gate = jnp.logical_and(alive_t, remaining > 0)
        s_fac = s_i if use_score else jnp.float32(1.0)
        # rep == -1 when this GT has no representative yet -> mask selects nothing.
        pull_s[...] = pull_s[...] + s_fac * jnp.where(
            jnp.logical_and(col == rep, pull_gate), pull_vec, 0.0)
        pullcnt_s[...] = pullcnt_s[...] + jnp.where(
            jnp.logical_and(sel_t, jnp.logical_and(alive_t, has_rep)), 1.0, 0.0)

        # -------- push loss over surviving overlapping proposals of other GTs ------
        if push_relax:
            safe_arg = jnp.where(m2, 1.0 + thr - iou_row, 1.0)
        else:
            safe_arg = jnp.where(m2, 1.0 - iou_row, 1.0)
        push_terms = -jnp.log(safe_arg)
        if use_score:
            push_terms = push_terms * scores
        push_gate = jnp.logical_and(alive_t, cnt2 > 0)
        inv_cnt2 = 1.0 / jnp.maximum(cnt2, 1).astype(jnp.float32)    # per-pick mean factor
        push_mask = jnp.logical_and(m2, push_gate)
        push_s[...] = push_s[...] + inv_cnt2 * jnp.where(push_mask, push_terms, 0.0)
        pushcnt_s[...] = pushcnt_s[...] + jnp.where(push_mask, 1.0, 0.0)

        # -------- state updates (predicated; everything is a no-op if t was suppressed)
        rep_s[i_gt] = jnp.where(jnp.logical_and(alive_t, jnp.logical_not(has_rep)),
                                t, rep).astype(jnp.int32)
        kill = jnp.logical_and(jnp.logical_or(sel_t, overlap), alive_t)
        alive_s[...] = jnp.where(kill, 0, alive_vec)

    total_pull = jnp.sum(pull_s[...])
    total_push = jnp.sum(push_s[...])
    pull_cnt = jnp.sum(pullcnt_s[...])
    push_cnt = jnp.sum(pushcnt_s[...])
    pull = total_pull / (pull_cnt + EPS)
    push = total_push / (push_cnt + EPS)
    lane = jax.lax.broadcasted_iota(jnp.int32, (1, out_ref.shape[-1]), 1)
    # Output lane convention: lane 0 = PUSH, lane 1 = PULL.  The host wrapper unpacks
    # out[:, 0, 0] as push and out[:, 0, 1] as pull -- keep the two in sync.
    out_ref[...] = jnp.where(lane == 0, push, jnp.where(lane == 1, pull, 0.0))


def nms_loss_pallas(nvalid, gtind_sm, pbox, pbox_t, gbox_t, gt_boxes, scores, gtind, *,
                    nms_thr, use_score, pull_relax, push_relax):
    img_num, m_pad, _ = pbox.shape
    g_pad = gt_boxes.shape[1]
    kernel = functools.partial(
        _nms_loss_kernel, nms_thr=nms_thr,
        use_score=use_score, pull_relax=pull_relax, push_relax=push_relax)

    # VMEM budget: the (M, M) IoU scratch is the only thing that scales badly with
    # m_pad.  Raise the scoped limit only when it would overflow the ~32 MiB default,
    # and stay below v7x's 64 MiB physical VMEM.
    lane = max(m_pad, 128)
    scratch_bytes = 4 * (m_pad * lane + max(g_pad, 8) * lane + 5 * 8 * lane)
    io_bytes = 4 * (2 * m_pad * 128 + 3 * 8 * lane + 8 * 128)
    vmem_limit = None
    if scratch_bytes + 2 * io_bytes > (24 << 20):
        vmem_limit = min(scratch_bytes + 2 * io_bytes + (8 << 20), 60 << 20)
    # TODO(synk): for very large m_pad, compute iou rows on the fly from the
    # coord-major tensors (only picked-and-alive rows are ever read) instead of
    # materializing the (M, M) scratch; also batch 8 images per grid step along the
    # sublane axis to amortize the serial candidate walk.

    out = pl.pallas_call(
        kernel,
        out_shape=jax.ShapeDtypeStruct((img_num, 1, 128), jnp.float32),
        grid_spec=pltpu.PrefetchScalarGridSpec(
            num_scalar_prefetch=2,
            grid=(img_num,),
            in_specs=[
                pl.BlockSpec((None, m_pad, 4), lambda i, nv, gsm: (i, 0, 0)),
                pl.BlockSpec((None, 4, m_pad), lambda i, nv, gsm: (i, 0, 0)),
                pl.BlockSpec((None, 4, m_pad), lambda i, nv, gsm: (i, 0, 0)),
                pl.BlockSpec((None, g_pad, 4), lambda i, nv, gsm: (i, 0, 0)),
                pl.BlockSpec((None, 1, m_pad), lambda i, nv, gsm: (i, 0, 0)),
                pl.BlockSpec((None, 1, m_pad), lambda i, nv, gsm: (i, 0, 0)),
            ],
            out_specs=pl.BlockSpec((None, 1, 128), lambda i, nv, gsm: (i, 0, 0)),
            scratch_shapes=[
                pltpu.VMEM((m_pad, m_pad), jnp.float32),   # proposal-proposal IoU
                pltpu.VMEM((g_pad, m_pad), jnp.float32),   # GT -> proposal IoU
                pltpu.VMEM((1, m_pad), jnp.int32),         # alive mask
                pltpu.VMEM((1, m_pad), jnp.float32),       # pull-loss accumulator
                pltpu.VMEM((1, m_pad), jnp.float32),       # push-loss accumulator
                pltpu.VMEM((1, m_pad), jnp.float32),       # pull-count accumulator
                pltpu.VMEM((1, m_pad), jnp.float32),       # push-count accumulator
                pltpu.SMEM((g_pad,), jnp.int32),           # per-GT representative (-1 unset)
            ]),
        compiler_params=pltpu.CompilerParams(
            dimension_semantics=("parallel",),             # images independent (v7x 2 TCs)
            vmem_limit_bytes=vmem_limit),
    )(nvalid, gtind_sm, pbox, pbox_t, gbox_t, gt_boxes, scores, gtind)
    return out[:, 0, 0], out[:, 0, 1]     # per-image (push, pull)


# ----------------------------------------------------------------------------
# Module wrapper (host glue: positive selection / gathers / presort / padding)
# ----------------------------------------------------------------------------
class FinalNMSLossPallas:
    """Forward-pass equivalent of mmdet FinalNMSLoss (no learnable parameters).

    fix_push_score / fix_push_reg / fix_pull_score / fix_pull_reg / push_select
    only affect gradient flow (detach), and add_gt is unused in the reference,
    so they do not change the forward value implemented here.
    """

    def __init__(self, reduction='none', loss_weight=1.0, use_score=True, add_gt=False,
                 pull_relax=True, push_relax=False, push_select=True,
                 pull_weight=1.0, push_weight=1.0, nms_thr=0.5,
                 m_pad=16, g_pad=8):
        self.use_score = use_score
        self.pull_relax = pull_relax
        self.push_relax = push_relax
        self.pull_weight = pull_weight
        self.push_weight = push_weight
        self.nms_thr = nms_thr
        self.m_pad = m_pad
        self.g_pad = g_pad

    def __call__(self, pos_inds, pos_gt_index, gt_bboxes, bbox_preds, cls_scores, gt_labels):
        img_num = len(pos_inds)
        assert img_num > 0
        m_pad, g_pad = self.m_pad, self.g_pad

        pbox = np.zeros((img_num, m_pad, 4), np.float32)
        gboxp = np.zeros((img_num, m_pad, 4), np.float32)       # assigned-GT box per proposal
        gtb = np.zeros((img_num, g_pad, 4), np.float32)         # true GT boxes
        scores = np.zeros((img_num, 1, m_pad), np.float32)
        gtind = np.zeros((img_num, 1, m_pad), np.int32)
        gtind_sm = np.zeros((img_num, m_pad), np.int32)
        nvalid = np.zeros((img_num,), np.int32)

        for k in range(img_num):
            inds = np.asarray(pos_inds[k]).astype(bool)
            gidx = np.asarray(pos_gt_index[k]).astype(np.int64)
            gtb_k = np.asarray(gt_bboxes[k], np.float32)
            ng = gtb_k.shape[0]
            assert ng <= g_pad
            gtb[k, :ng] = gtb_k
            m = int(inds.sum())
            nvalid[k] = m
            if m == 0:
                continue
            assert m <= m_pad
            assert int(gidx.max()) < g_pad
            bp = np.asarray(bbox_preds[k], np.float32)                 # (m, 4)
            cs = np.asarray(cls_scores[k], np.float32)[inds]           # (m, C)
            lbl = np.asarray(gt_labels[k]).astype(np.int64)[gidx]      # (m,)
            sc = cs[np.arange(m), lbl]                                 # (m,)
            gb = gtb_k[gidx]                                           # (m, 4)
            # Host presort: descending score; among ties the larger original index
            # comes first, exactly matching the reference's pop-from-end of a stable
            # ascending argsort.
            order = np.argsort(sc, kind="stable")[::-1]
            pbox[k, :m] = bp[order]
            gboxp[k, :m] = gb[order]
            scores[k, 0, :m] = sc[order]
            g_sorted = gidx[order].astype(np.int32)
            gtind[k, 0, :m] = g_sorted
            gtind_sm[k, :m] = g_sorted

        push, pull = nms_loss_pallas(
            jnp.asarray(nvalid), jnp.asarray(gtind_sm),
            jnp.asarray(pbox), jnp.asarray(np.transpose(pbox, (0, 2, 1))),
            jnp.asarray(np.transpose(gboxp, (0, 2, 1))), jnp.asarray(gtb),
            jnp.asarray(scores), jnp.asarray(gtind),
            nms_thr=self.nms_thr,
            use_score=self.use_score, pull_relax=self.pull_relax,
            push_relax=self.push_relax)

        return {'nms_push_loss': jnp.mean(push) * self.push_weight,
                'nms_pull_loss': jnp.mean(pull) * self.pull_weight}


# ----------------------------------------------------------------------------
# NumPy reference (direct transcription of the PyTorch code)
# ----------------------------------------------------------------------------
def _bbox_overlaps_np(b1, b2):
    b1 = b1.astype(np.float32); b2 = b2.astype(np.float32)
    lt = np.maximum(b1[:, None, :2], b2[None, :, :2])
    rb = np.minimum(b1[:, None, 2:], b2[None, :, 2:])
    wh = np.clip(rb - lt + 1.0, 0.0, None)
    overlap = wh[:, :, 0] * wh[:, :, 1]
    area1 = (b1[:, 2] - b1[:, 0] + 1.0) * (b1[:, 3] - b1[:, 1] + 1.0)
    area2 = (b2[:, 2] - b2[:, 0] + 1.0) * (b2[:, 3] - b2[:, 1] + 1.0)
    return overlap / (area1[:, None] + area2[None, :] - overlap)


def _single_nms_loss_ref(gt_inds, gt_index, gt_box, bbox_preds, cls_scores, gt_labels,
                         nms_thr, use_score, pull_relax, push_relax):
    eps = 1e-6
    if int(gt_inds.sum()) <= 1:
        return 0.0, 0.0
    lbl = gt_labels[gt_index]
    sel = cls_scores[gt_inds]
    scores = sel[np.arange(len(lbl)), lbl].astype(np.float32)
    iou = _bbox_overlaps_np(bbox_preds, bbox_preds)
    gt_iou = _bbox_overlaps_np(gt_box, gt_box)
    idx = list(np.argsort(scores, kind="stable"))
    rec = {}
    total_pull = 0.0; total_push = 0.0; pull_cnt = 0; push_cnt = 0
    while len(idx) > 0:
        i = idx.pop()
        i_gt = int(gt_index[i])
        if i_gt in rec:
            rep = rec[i_gt]
            msi = max(float(iou[rep, i]), eps)
            pull = -np.log(1.0 - nms_thr + msi) if pull_relax else -np.log(msi)
            if use_score:
                pull = pull * float(scores[i])
            pull_cnt += 1
        else:
            rec[i_gt] = i
            pull = 0.0
        if len(idx) == 0:
            break
        idx_arr = np.array(idx, dtype=np.int64)
        cur_iou = iou[i, idx_arr]
        ov = cur_iou > nms_thr
        ov_iou = cur_iou[ov]; ov_idx = idx_arr[ov]
        cur_gt = gt_index[ov_idx]; cur_sc = scores[ov_idx]
        pm = cur_gt != i_gt
        if pm.sum() != 0:
            cur_gt_iou = gt_iou[i_gt][cur_gt]
            pls = -np.log(1.0 + nms_thr - ov_iou) if push_relax else -np.log(1.0 - ov_iou)
            if use_score:
                pls = pls * cur_sc
            pm2 = pm & (ov_iou > cur_gt_iou)
            if pm2.sum() != 0:
                push = float(np.mean(pls[pm2])); push_cnt += int(pm2.sum())
            else:
                push = 0.0
        else:
            push = 0.0
        total_pull += float(pull)
        total_push += push
        idx = list(idx_arr[~ov])
    return total_push / (push_cnt + eps), total_pull / (pull_cnt + eps)


def _final_nms_loss_ref(pos_inds, pos_gt_index, gt_bboxes, bbox_preds, cls_scores, gt_labels,
                        pull_weight, push_weight, nms_thr, use_score, pull_relax, push_relax):
    n = len(pos_inds)
    push = 0.0; pull = 0.0
    for k in range(n):
        p, q = _single_nms_loss_ref(
            np.asarray(pos_inds[k]).astype(bool),
            np.asarray(pos_gt_index[k]).astype(np.int64),
            np.asarray(gt_bboxes[k], np.float32),
            np.asarray(bbox_preds[k], np.float32),
            np.asarray(cls_scores[k], np.float32),
            np.asarray(gt_labels[k]).astype(np.int64),
            nms_thr, use_score, pull_relax, push_relax)
        push += p; pull += q
    return push / n * push_weight, pull / n * pull_weight


# ----------------------------------------------------------------------------
if __name__ == "__main__":
    key = jax.random.PRNGKey(0)
    IMG, A, C, G = 2, 64, 4, 3           # images, anchors, classes, gts/image
    M_list = [10, 12]                    # positives per image

    pos_inds, pos_gt_index, gt_bboxes, bbox_preds, cls_scores, gt_labels = [], [], [], [], [], []
    for k_img in range(IMG):
        key, k1, k2, k3, k4, k5, k6 = jax.random.split(key, 7)
        m = M_list[k_img]
        xy = jax.random.uniform(k1, (G, 2), minval=0.0, maxval=60.0)
        wh = jax.random.uniform(k2, (G, 2), minval=10.0, maxval=40.0)
        gtb = jnp.concatenate([xy, xy + wh], axis=1)                     # (G, 4)
        glab = jax.random.randint(k3, (G,), 0, C)                        # (G,)
        gidx = jax.random.randint(k4, (m,), 0, G)                        # (m,)
        noise = jax.random.normal(k5, (m, 4)) * 3.0
        bp = gtb[gidx] + noise
        x1 = jnp.minimum(bp[:, 0], bp[:, 2]); x2 = jnp.maximum(bp[:, 0], bp[:, 2]) + 1.0
        y1 = jnp.minimum(bp[:, 1], bp[:, 3]); y2 = jnp.maximum(bp[:, 1], bp[:, 3]) + 1.0
        bp = jnp.stack([x1, y1, x2, y2], axis=1)                         # (m, 4)
        cs = jax.nn.sigmoid(jax.random.normal(k6, (A, C)))               # (A, C)
        inds = jnp.zeros((A,), jnp.bool_).at[:m].set(True)               # (A,)
        pos_inds.append(inds); pos_gt_index.append(gidx); gt_bboxes.append(gtb)
        bbox_preds.append(bp); cls_scores.append(cs); gt_labels.append(glab)

    loss_mod = FinalNMSLossPallas(pull_weight=1.0, push_weight=1.0, nms_thr=0.5)
    out = loss_mod(pos_inds, pos_gt_index, gt_bboxes, bbox_preds, cls_scores, gt_labels)
    push = float(jax.block_until_ready(out['nms_push_loss']))
    pull = float(jax.block_until_ready(out['nms_pull_loss']))

    ref_push, ref_pull = _final_nms_loss_ref(
        pos_inds, pos_gt_index, gt_bboxes, bbox_preds, cls_scores, gt_labels,
        pull_weight=1.0, push_weight=1.0, nms_thr=0.5,
        use_score=True, pull_relax=True, push_relax=False)

    assert np.allclose(push, ref_push, rtol=5e-3, atol=5e-4), (push, ref_push)
    assert np.allclose(pull, ref_pull, rtol=5e-3, atol=5e-4), (pull, ref_pull)
    print("KERNEL_OK")
</pallas_src>

<mosaic_0001>
module attributes {stable_mosaic.version = 11 : i64} {
  func.func @_nms_loss_kernel(%arg0: i32, %arg1: memref<2xi32, #tpu.memory_space<smem>>, %arg2: memref<2x16xi32, #tpu.memory_space<smem>>, %arg3: memref<1x16x4xf32, #tpu.memory_space<vmem>>, %arg4: memref<1x4x16xf32, #tpu.memory_space<vmem>>, %arg5: memref<1x4x16xf32, #tpu.memory_space<vmem>>, %arg6: memref<1x8x4xf32, #tpu.memory_space<vmem>>, %arg7: memref<1x1x16xf32, #tpu.memory_space<vmem>>, %arg8: memref<1x1x16xi32, #tpu.memory_space<vmem>>, %arg9: memref<1x1x128xf32, #tpu.memory_space<vmem>>, %arg10: memref<16x16xf32, #tpu.memory_space<vmem>>, %arg11: memref<8x16xf32, #tpu.memory_space<vmem>>, %arg12: memref<1x16xi32, #tpu.memory_space<vmem>>, %arg13: memref<1x16xf32, #tpu.memory_space<vmem>>, %arg14: memref<1x16xf32, #tpu.memory_space<vmem>>, %arg15: memref<1x16xf32, #tpu.memory_space<vmem>>, %arg16: memref<1x16xf32, #tpu.memory_space<vmem>>, %arg17: memref<8xi32, #tpu.memory_space<smem>>) attributes {dimension_semantics = [#tpu.dimension_semantics<parallel>], iteration_bounds = array<i64: 2>, scalar_prefetch = 2 : i64, scratch_operands = 8 : i64, tpu.core_type = #tpu.core_type<tc>, window_params = [{transform_indices = @transform_0, window_bounds = array<i64: 1, 16, 4>}, {transform_indices = @transform_1, window_bounds = array<i64: 1, 4, 16>}, {transform_indices = @transform_2, window_bounds = array<i64: 1, 4, 16>}, {transform_indices = @transform_3, window_bounds = array<i64: 1, 8, 4>}, {transform_indices = @transform_4, window_bounds = array<i64: 1, 1, 16>}, {transform_indices = @transform_5, window_bounds = array<i64: 1, 1, 16>}, {transform_indices = @transform_6, window_bounds = array<i64: 1, 1, 128>}]} {
    %0 = arith.index_cast %arg0 : i32 to index
    %1 = memref.load %arg1[%0] : memref<2xi32, #tpu.memory_space<smem>>
    %c0 = arith.constant 0 : index
    %c0_0 = arith.constant 0 : index
    %c0_1 = arith.constant 0 : index
    %2 = vector.load %arg3[%c0, %c0_0, %c0_1] : memref<1x16x4xf32, #tpu.memory_space<vmem>>, vector<1x16x4xf32>
    %3 = vector.shape_cast %2 : vector<1x16x4xf32> to vector<16x4xf32>
    %c0_2 = arith.constant 0 : index
    %c0_3 = arith.constant 0 : index
    %c0_4 = arith.constant 0 : index
    %4 = vector.load %arg4[%c0_2, %c0_3, %c0_4] : memref<1x4x16xf32, #tpu.memory_space<vmem>>, vector<1x4x16xf32>
    %5 = vector.shape_cast %4 : vector<1x4x16xf32> to vector<4x16xf32>
    %6 = vector.extract_strided_slice %3 {offsets = [0, 0], sizes = [16, 1], strides = [1, 1]} : vector<16x4xf32> to vector<16x1xf32>
    %7 = vector.extract_strided_slice %3 {offsets = [0, 1], sizes = [16, 1], strides = [1, 1]} : vector<16x4xf32> to vector<16x1xf32>
    %8 = vector.extract_strided_slice %3 {offsets = [0, 2], sizes = [16, 1], strides = [1, 1]} : vector<16x4xf32> to vector<16x1xf32>
    %9 = vector.extract_strided_slice %3 {offsets = [0, 3], sizes = [16, 1], strides = [1, 1]} : vector<16x4xf32> to vector<16x1xf32>
    %10 = vector.extract_strided_slice %5 {offsets = [0, 0], sizes = [1, 16], strides = [1, 1]} : vector<4x16xf32> to vector<1x16xf32>
    %11 = vector.extract_strided_slice %5 {offsets = [1, 0], sizes = [1, 16], strides = [1, 1]} : vector<4x16xf32> to vector<1x16xf32>
    %12 = vector.extract_strided_slice %5 {offsets = [2, 0], sizes = [1, 16], strides = [1, 1]} : vector<4x16xf32> to vector<1x16xf32>
    %13 = vector.extract_strided_slice %5 {offsets = [3, 0], sizes = [1, 16], strides = [1, 1]} : vector<4x16xf32> to vector<1x16xf32>
    %14 = vector.broadcast %8 : vector<16x1xf32> to vector<16x16xf32>
    %15 = vector.broadcast %12 : vector<1x16xf32> to vector<16x16xf32>
    %16 = arith.minimumf %14, %15 : vector<16x16xf32>
    %17 = vector.broadcast %6 : vector<16x1xf32> to vector<16x16xf32>
    %18 = vector.broadcast %10 : vector<1x16xf32> to vector<16x16xf32>
    %19 = arith.maximumf %17, %18 : vector<16x16xf32>
    %20 = arith.subf %16, %19 : vector<16x16xf32>
    %cst = arith.constant 1.000000e+00 : f32
    %21 = vector.broadcast %cst : f32 to vector<16x16xf32>
    %22 = arith.addf %20, %21 : vector<16x16xf32>
    %cst_5 = arith.constant 0.000000e+00 : f32
    %23 = vector.broadcast %cst_5 : f32 to vector<16x16xf32>
    %24 = arith.maximumf %22, %23 : vector<16x16xf32>
    %25 = vector.broadcast %9 : vector<16x1xf32> to vector<16x16xf32>
    %26 = vector.broadcast %13 : vector<1x16xf32> to vector<16x16xf32>
    %27 = arith.minimumf %25, %26 : vector<16x16xf32>
    %28 = vector.broadcast %7 : vector<16x1xf32> to vector<16x16xf32>
    %29 = vector.broadcast %11 : vector<1x16xf32> to vector<16x16xf32>
    %30 = arith.maximumf %28, %29 : vector<16x16xf32>
    %31 = arith.subf %27, %30 : vector<16x16xf32>
    %cst_6 = arith.constant 1.000000e+00 : f32
    %32 = vector.broadcast %cst_6 : f32 to vector<16x16xf32>
    %33 = arith.addf %31, %32 : vector<16x16xf32>
    %cst_7 = arith.constant 0.000000e+00 : f32
    %34 = vector.broadcast %cst_7 : f32 to vector<16x16xf32>
    %35 = arith.maximumf %33, %34 : vector<16x16xf32>
    %36 = arith.mulf %24, %35 : vector<16x16xf32>
    %37 = arith.subf %8, %6 : vector<16x1xf32>
    %cst_8 = arith.constant 1.000000e+00 : f32
    %38 = vector.broadcast %cst_8 : f32 to vector<16x1xf32>
    %39 = arith.addf %37, %38 : vector<16x1xf32>
    %40 = arith.subf %9, %7 : vector<16x1xf32>
    %cst_9 = arith.constant 1.000000e+00 : f32
    %41 = vector.broadcast %cst_9 : f32 to vector<16x1xf32>
    %42 = arith.addf %40, %41 : vector<16x1xf32>
    %43 = arith.mulf %39, %42 : vector<16x1xf32>
    %44 = arith.subf %12, %10 : vector<1x16xf32>
    %cst_10 = arith.constant 1.000000e+00 : f32
    %45 = vector.broadcast %cst_10 : f32 to vector<1x16xf32>
    %46 = arith.addf %44, %45 : vector<1x16xf32>
    %47 = arith.subf %13, %11 : vector<1x16xf32>
    %cst_11 = arith.constant 1.000000e+00 : f32
    %48 = vector.broadcast %cst_11 : f32 to vector<1x16xf32>
    %49 = arith.addf %47, %48 : vector<1x16xf32>
    %50 = arith.mulf %46, %49 : vector<1x16xf32>
    %51 = vector.broadcast %43 : vector<16x1xf32> to vector<16x16xf32>
    %52 = vector.broadcast %50 : vector<1x16xf32> to vector<16x16xf32>
    %53 = arith.addf %51, %52 : vector<16x16xf32>
    %54 = arith.subf %53, %36 : vector<16x16xf32>
    %55 = arith.divf %36, %54 : vector<16x16xf32>
    %c0_12 = arith.constant 0 : index
    %c0_13 = arith.constant 0 : index
    %56 = vector.load %arg10[%c0_12, %c0_13] : memref<16x16xf32, #tpu.memory_space<vmem>>, vector<16x16xf32>
    tpu.vector_store %arg10[%c0_12, %c0_13], %55 {strides = array<i32>} : memref<16x16xf32, #tpu.memory_space<vmem>>, vector<16x16xf32>,
    %c0_14 = arith.constant 0 : index
    %c0_15 = arith.constant 0 : index
    %c0_16 = arith.constant 0 : index
    %57 = vector.load %arg6[%c0_14, %c0_15, %c0_16] : memref<1x8x4xf32, #tpu.memory_space<vmem>>, vector<1x8x4xf32>
    %58 = vector.shape_cast %57 : vector<1x8x4xf32> to vector<8x4xf32>
    %c0_17 = arith.constant 0 : index
    %c0_18 = arith.constant 0 : index
    %c0_19 = arith.constant 0 : index
    %59 = vector.load %arg5[%c0_17, %c0_18, %c0_19] : memref<1x4x16xf32, #tpu.memory_space<vmem>>, vector<1x4x16xf32>
    %60 = vector.shape_cast %59 : vector<1x4x16xf32> to vector<4x16xf32>
    %61 = vector.extract_strided_slice %58 {offsets = [0, 0], sizes = [8, 1], strides = [1, 1]} : vector<8x4xf32> to vector<8x1xf32>
    %62 = vector.extract_strided_slice %58 {offsets = [0, 1], sizes = [8, 1], strides = [1, 1]} : vector<8x4xf32> to vector<8x1xf32>
    %63 = vector.extract_strided_slice %58 {offsets = [0, 2], sizes = [8, 1], strides = [1, 1]} : vector<8x4xf32> to vector<8x1xf32>
    %64 = vector.extract_strided_slice %58 {offsets = [0, 3], sizes = [8, 1], strides = [1, 1]} : vector<8x4xf32> to vector<8x1xf32>
    %65 = vector.extract_strided_slice %60 {offsets = [0, 0], sizes = [1, 16], strides = [1, 1]} : vector<4x16xf32> to vector<1x16xf32>
    %66 = vector.extract_strided_slice %60 {offsets = [1, 0], sizes = [1, 16], strides = [1, 1]} : vector<4x16xf32> to vector<1x16xf32>
    %67 = vector.extract_strided_slice %60 {offsets = [2, 0], sizes = [1, 16], strides = [1, 1]} : vector<4x16xf32> to vector<1x16xf32>
    %68 = vector.extract_strided_slice %60 {offsets = [3, 0], sizes = [1, 16], strides = [1, 1]} : vector<4x16xf32> to vector<1x16xf32>
    %69 = vector.broadcast %63 : vector<8x1xf32> to vector<8x16xf32>
    %70 = vector.broadcast %67 : vector<1x16xf32> to vector<8x16xf32>
    %71 = arith.minimumf %69, %70 : vector<8x16xf32>
    %72 = vector.broadcast %61 : vector<8x1xf32> to vector<8x16xf32>
    %73 = vector.broadcast %65 : vector<1x16xf32> to vector<8x16xf32>
    %74 = arith.maximumf %72, %73 : vector<8x16xf32>
    %75 = arith.subf %71, %74 : vector<8x16xf32>
    %cst_20 = arith.constant 1.000000e+00 : f32
    %76 = vector.broadcast %cst_20 : f32 to vector<8x16xf32>
    %77 = arith.addf %75, %76 : vector<8x16xf32>
    %cst_21 = arith.constant 0.000000e+00 : f32
    %78 = vector.broadcast %cst_21 : f32 to vector<8x16xf32>
    %79 = arith.maximumf %77, %78 : vector<8x16xf32>
    %80 = vector.broadcast %64 : vector<8x1xf32> to vector<8x16xf32>
    %81 = vector.broadcast %68 : vector<1x16xf32> to vector<8x16xf32>
    %82 = arith.minimumf %80, %81 : vector<8x16xf32>
    %83 = vector.broadcast %62 : vector<8x1xf32> to vector<8x16xf32>
    %84 = vector.broadcast %66 : vector<1x16xf32> to vector<8x16xf32>
    %85 = arith.maximumf %83, %84 : vector<8x16xf32>
    %86 = arith.subf %82, %85 : vector<8x16xf32>
    %cst_22 = arith.constant 1.000000e+00 : f32
    %87 = vector.broadcast %cst_22 : f32 to vector<8x16xf32>
    %88 = arith.addf %86, %87 : vector<8x16xf32>
    %cst_23 = arith.constant 0.000000e+00 : f32
    %89 = vector.broadcast %cst_23 : f32 to vector<8x16xf32>
    %90 = arith.maximumf %88, %89 : vector<8x16xf32>
    %91 = arith.mulf %79, %90 : vector<8x16xf32>
    %92 = arith.subf %63, %61 : vector<8x1xf32>
    %cst_24 = arith.constant 1.000000e+00 : f32
    %93 = vector.broadcast %cst_24 : f32 to vector<8x1xf32>
    %94 = arith.addf %92, %93 : vector<8x1xf32>
    %95 = arith.subf %64, %62 : vector<8x1xf32>
    %cst_25 = arith.constant 1.000000e+00 : f32
    %96 = vector.broadcast %cst_25 : f32 to vector<8x1xf32>
    %97 = arith.addf %95, %96 : vector<8x1xf32>
    %98 = arith.mulf %94, %97 : vector<8x1xf32>
    %99 = arith.subf %67, %65 : vector<1x16xf32>
    %cst_26 = arith.constant 1.000000e+00 : f32
    %100 = vector.broadcast %cst_26 : f32 to vector<1x16xf32>
    %101 = arith.addf %99, %100 : vector<1x16xf32>
    %102 = arith.subf %68, %66 : vector<1x16xf32>
    %cst_27 = arith.constant 1.000000e+00 : f32
    %103 = vector.broadcast %cst_27 : f32 to vector<1x16xf32>
    %104 = arith.addf %102, %103 : vector<1x16xf32>
    %105 = arith.mulf %101, %104 : vector<1x16xf32>
    %106 = vector.broadcast %98 : vector<8x1xf32> to vector<8x16xf32>
    %107 = vector.broadcast %105 : vector<1x16xf32> to vector<8x16xf32>
    %108 = arith.addf %106, %107 : vector<8x16xf32>
    %109 = arith.subf %108, %91 : vector<8x16xf32>
    %110 = arith.divf %91, %109 : vector<8x16xf32>
    %c0_28 = arith.constant 0 : index
    %c0_29 = arith.constant 0 : index
    %111 = vector.load %arg11[%c0_28, %c0_29] : memref<8x16xf32, #tpu.memory_space<vmem>>, vector<8x16xf32>
    tpu.vector_store %arg11[%c0_28, %c0_29], %110 {strides = array<i32>} : memref<8x16xf32, #tpu.memory_space<vmem>>, vector<8x16xf32>,
    %c0_30 = arith.constant 0 : index
    %c0_31 = arith.constant 0 : index
    %c0_32 = arith.constant 0 : index
    %112 = vector.load %arg7[%c0_30, %c0_31, %c0_32] : memref<1x1x16xf32, #tpu.memory_space<vmem>>, vector<1x1x16xf32>
    %113 = vector.shape_cast %112 : vector<1x1x16xf32> to vector<1x16xf32>
    %c0_33 = arith.constant 0 : index
    %c0_34 = arith.constant 0 : index
    %c0_35 = arith.constant 0 : index
    %114 = vector.load %arg8[%c0_33, %c0_34, %c0_35] : memref<1x1x16xi32, #tpu.memory_space<vmem>>, vector<1x1x16xi32>
    %115 = vector.shape_cast %114 : vector<1x1x16xi32> to vector<1x16xi32>
    %116 = tpu.iota {dimensions = array<i32: 1>} : vector<1x16xi32>
    %117 = vector.broadcast %1 : i32 to vector<1x16xi32>
    %118 = arith.cmpi slt, %116, %117 : vector<1x16xi32>
    %119 = arith.extui %118 : vector<1x16xi1> to vector<1x16xi32>
    %c0_36 = arith.constant 0 : index
    %c0_37 = arith.constant 0 : index
    %120 = vector.load %arg12[%c0_36, %c0_37] : memref<1x16xi32, #tpu.memory_space<vmem>>, vector<1x16xi32>
    tpu.vector_store %arg12[%c0_36, %c0_37], %119 {strides = array<i32>} : memref<1x16xi32, #tpu.memory_space<vmem>>, vector<1x16xi32>,
    %cst_38 = arith.constant 0.000000e+00 : f32
    %121 = vector.broadcast %cst_38 : f32 to vector<1x16xf32>
    %c0_39 = arith.constant 0 : index
    %c0_40 = arith.constant 0 : index
    %122 = vector.load %arg13[%c0_39, %c0_40] : memref<1x16xf32, #tpu.memory_space<vmem>>, vector<1x16xf32>
    tpu.vector_store %arg13[%c0_39, %c0_40], %121 {strides = array<i32>} : memref<1x16xf32, #tpu.memory_space<vmem>>, vector<1x16xf32>,
    %cst_41 = arith.constant 0.000000e+00 : f32
    %123 = vector.broadcast %cst_41 : f32 to vector<1x16xf32>
    %c0_42 = arith.constant 0 : index
    %c0_43 = arith.constant 0 : index
    %124 = vector.load %arg14[%c0_42, %c0_43] : memref<1x16xf32, #tpu.memory_space<vmem>>, vector<1x16xf32>
    tpu.vector_store %arg14[%c0_42, %c0_43], %123 {strides = array<i32>} : memref<1x16xf32, #tpu.memory_space<vmem>>, vector<1x16xf32>,
    %cst_44 = arith.constant 0.000000e+00 : f32
    %125 = vector.broadcast %cst_44 : f32 to vector<1x16xf32>
    %c0_45 = arith.constant 0 : index
    %c0_46 = arith.constant 0 : index
    %126 = vector.load %arg15[%c0_45, %c0_46] : memref<1x16xf32, #tpu.memory_space<vmem>>, vector<1x16xf32>
    tpu.vector_store %arg15[%c0_45, %c0_46], %125 {strides = array<i32>} : memref<1x16xf32, #tpu.memory_space<vmem>>, vector<1x16xf32>,
    %cst_47 = arith.constant 0.000000e+00 : f32
    %127 = vector.broadcast %cst_47 : f32 to vector<1x16xf32>
    %c0_48 = arith.constant 0 : index
    %c0_49 = arith.constant 0 : index
    %128 = vector.load %arg16[%c0_48, %c0_49] : memref<1x16xf32, #tpu.memory_space<vmem>>, vector<1x16xf32>
    tpu.vector_store %arg16[%c0_48, %c0_49], %127 {strides = array<i32>} : memref<1x16xf32, #tpu.memory_space<vmem>>, vector<1x16xf32>,
    %c-1_i32 = arith.constant -1 : i32
    %c0_50 = arith.constant 0 : index
    %129 = memref.load %arg17[%c0_50] : memref<8xi32, #tpu.memory_space<smem>>
    memref.store %c-1_i32, %arg17[%c0_50] : memref<8xi32, #tpu.memory_space<smem>>
    %c-1_i32_51 = arith.constant -1 : i32
    %c1 = arith.constant 1 : index
    %130 = memref.load %arg17[%c1] : memref<8xi32, #tpu.memory_space<smem>>
    memref.store %c-1_i32_51, %arg17[%c1] : memref<8xi32, #tpu.memory_space<smem>>
    %c-1_i32_52 = arith.constant -1 : i32
    %c2 = arith.constant 2 : index
    %131 = memref.load %arg17[%c2] : memref<8xi32, #tpu.memory_space<smem>>
    memref.store %c-1_i32_52, %arg17[%c2] : memref<8xi32, #tpu.memory_space<smem>>
    %c-1_i32_53 = arith.constant -1 : i32
    %c3 = arith.constant 3 : index
    %132 = memref.load %arg17[%c3] : memref<8xi32, #tpu.memory_space<smem>>
    memref.store %c-1_i32_53, %arg17[%c3] : memref<8xi32, #tpu.memory_space<smem>>
    %c-1_i32_54 = arith.constant -1 : i32
    %c4 = arith.constant 4 : index
    %133 = memref.load %arg17[%c4] : memref<8xi32, #tpu.memory_space<smem>>
    memref.store %c-1_i32_54, %arg17[%c4] : memref<8xi32, #tpu.memory_space<smem>>
    %c-1_i32_55 = arith.constant -1 : i32
    %c5 = arith.constant 5 : index
    %134 = memref.load %arg17[%c5] : memref<8xi32, #tpu.memory_space<smem>>
    memref.store %c-1_i32_55, %arg17[%c5] : memref<8xi32, #tpu.memory_space<smem>>
    %c-1_i32_56 = arith.constant -1 : i32
    %c6 = arith.constant 6 : index
    %135 = memref.load %arg17[%c6] : memref<8xi32, #tpu.memory_space<smem>>
    memref.store %c-1_i32_56, %arg17[%c6] : memref<8xi32, #tpu.memory_space<smem>>
    %c-1_i32_57 = arith.constant -1 : i32
    %c7 = arith.constant 7 : index
    %136 = memref.load %arg17[%c7] : memref<8xi32, #tpu.memory_space<smem>>
    memref.store %c-1_i32_57, %arg17[%c7] : memref<8xi32, #tpu.memory_space<smem>>
    %c0_i32 = arith.constant 0 : i32
    %137 = arith.subi %1, %c0_i32 : i32
    %c1_i32 = arith.constant 1 : i32
    %c1_i32_58 = arith.constant 1 : i32
    %138 = arith.subi %c1_i32, %c1_i32_58 : i32
    %139 = arith.addi %137, %138 : i32
    %c1_i32_59 = arith.constant 1 : i32
    %140 = arith.divsi %139, %c1_i32_59 : i32
    %c1_i32_60 = arith.constant 1 : i32
    %c0_i32_61 = arith.constant 0 : i32
    %cst_62 = arith.constant 5.000000e-01 : f32
    %c0_i32_63 = arith.constant 0 : i32
    %141 = arith.subi %140, %c0_i32_63 : i32
    %142 = arith.addi %c0_i32_63, %141 : i32
    %c1_i32_64 = arith.constant 1 : i32
    scf.for %arg18 = %c0_i32_63 to %142 step %c1_i32_64  : i32 {
      %180 = arith.muli %arg18, %c1_i32_60 : i32
      %181 = arith.addi %c0_i32_61, %180 : i32
      %182 = arith.index_cast %arg0 : i32 to index
      %183 = arith.index_cast %181 : i32 to index
      %184 = memref.load %arg2[%182, %183] : memref<2x16xi32, #tpu.memory_space<smem>>
      %185 = arith.index_cast %184 : i32 to index
      %186 = memref.load %arg17[%185] : memref<8xi32, #tpu.memory_space<smem>>
      %c0_i32_85 = arith.constant 0 : i32
      %187 = arith.cmpi sge, %186, %c0_i32_85 : i32
      %c0_86 = arith.constant 0 : index
      %c0_87 = arith.constant 0 : index
      %188 = vector.load %arg12[%c0_86, %c0_87] : memref<1x16xi32, #tpu.memory_space<vmem>>, vector<1x16xi32>
      %c0_i32_88 = arith.constant 0 : i32
      %189 = vector.broadcast %c0_i32_88 : i32 to vector<1x16xi32>
      %190 = arith.cmpi sgt, %188, %189 : vector<1x16xi32>
      %191 = vector.broadcast %181 : i32 to vector<1x16xi32>
      %192 = arith.cmpi eq, %116, %191 : vector<1x16xi32>
      %cst_89 = arith.constant dense<true> : vector<1x16xi1>
      %193 = arith.xori %192, %cst_89 : vector<1x16xi1>
      %194 = arith.andi %190, %193 : vector<1x16xi1>
      %195 = arith.index_cast %181 : i32 to index
      %c0_90 = arith.constant 0 : index
      %196 = vector.load %arg10[%195, %c0_90] : memref<16x16xf32, #tpu.memory_space<vmem>>, vector<1x16xf32>
      %197 = arith.index_cast %184 : i32 to index
      %c0_91 = arith.constant 0 : index
      %198 = vector.load %arg11[%197, %c0_91] : memref<8x16xf32, #tpu.memory_space<vmem>>, vector<1x16xf32>
      %199 = vector.broadcast %cst_62 : f32 to vector<1x16xf32>
      %200 = arith.cmpf ogt, %196, %199 : vector<1x16xf32>
      %201 = arith.andi %194, %200 : vector<1x16xi1>
      %202 = vector.broadcast %184 : i32 to vector<1x16xi32>
      %203 = arith.cmpi ne, %115, %202 : vector<1x16xi32>
      %204 = arith.andi %201, %203 : vector<1x16xi1>
      %205 = arith.cmpf ogt, %196, %198 : vector<1x16xf32>
      %206 = arith.andi %204, %205 : vector<1x16xi1>
      %c0_i32_92 = arith.constant 0 : i32
      %207 = vector.broadcast %c0_i32_92 : i32 to vector<1x16xi32>
      %208 = arith.select %192, %188, %207 : vector<1x16xi1>, vector<1x16xi32>
      %209 = vector.shape_cast %208 : vector<1x16xi32> to vector<1x1x16xi32>
      %cst_93 = arith.constant dense<0> : vector<1xi32>
      %210 = vector.multi_reduction <add>, %209, %cst_93 [1, 2] : vector<1x1x16xi32> to vector<1xi32>
      %211 = vector.shape_cast %210 : vector<1xi32> to vector<1x1x1xi32>
      %212 = vector.extract %211[0, 0, 0] : i32 from vector<1x1x1xi32>
      %c0_i32_94 = arith.constant 0 : i32
      %213 = arith.cmpi sgt, %212, %c0_i32_94 : i32
      %214 = arith.extui %194 : vector<1x16xi1> to vector<1x16xi32>
      %215 = vector.shape_cast %214 : vector<1x16xi32> to vector<1x1x16xi32>
      %cst_95 = arith.constant dense<0> : vector<1xi32>
      %216 = vector.multi_reduction <add>, %215, %cst_95 [1, 2] : vector<1x1x16xi32> to vector<1xi32>
      %217 = vector.shape_cast %216 : vector<1xi32> to vector<1x1x1xi32>
      %218 = vector.extract %217[0, 0, 0] : i32 from vector<1x1x1xi32>
      %219 = arith.extui %206 : vector<1x16xi1> to vector<1x16xi32>
      %220 = vector.shape_cast %219 : vector<1x16xi32> to vector<1x1x16xi32>
      %cst_96 = arith.constant dense<0> : vector<1xi32>
      %221 = vector.multi_reduction <add>, %220, %cst_96 [1, 2] : vector<1x1x16xi32> to vector<1xi32>
      %222 = vector.shape_cast %221 : vector<1xi32> to vector<1x1x1xi32>
      %223 = vector.extract %222[0, 0, 0] : i32 from vector<1x1x1xi32>
      %cst_97 = arith.constant 0.000000e+00 : f32
      %224 = vector.broadcast %cst_97 : f32 to vector<1x16xf32>
      %225 = arith.select %192, %113, %224 : vector<1x16xi1>, vector<1x16xf32>
      %226 = vector.shape_cast %225 : vector<1x16xf32> to vector<1x1x16xf32>
      %cst_98 = arith.constant dense<0.000000e+00> : vector<1xf32>
      %227 = vector.multi_reduction <add>, %226, %cst_98 [1, 2] : vector<1x1x16xf32> to vector<1xf32>
      %228 = vector.shape_cast %227 : vector<1xf32> to vector<1x1x1xf32>
      %229 = vector.extract %228[0, 0, 0] : f32 from vector<1x1x1xf32>
      %cst_99 = arith.constant 1.000000e+00 : f32
      %230 = arith.subf %cst_99, %cst_62 : f32
      %cst_100 = arith.constant 9.99999997E-7 : f32
      %231 = vector.broadcast %cst_100 : f32 to vector<1x16xf32>
      %232 = arith.maximumf %196, %231 : vector<1x16xf32>
      %233 = vector.broadcast %230 : f32 to vector<1x16xf32>
      %234 = arith.addf %233, %232 : vector<1x16xf32>
      %235 = math.log %234 : vector<1x16xf32>
      %cst_101 = arith.constant 0.000000e+00 : f32
      %236 = vector.broadcast %cst_101 : f32 to vector<1x16xf32>
      %237 = arith.subf %236, %235 : vector<1x16xf32>
      %c0_i32_102 = arith.constant 0 : i32
      %238 = arith.cmpi sgt, %218, %c0_i32_102 : i32
      %239 = arith.andi %213, %238 : i1
      %c0_103 = arith.constant 0 : index
      %c0_104 = arith.constant 0 : index
      %240 = vector.load %arg13[%c0_103, %c0_104] : memref<1x16xf32, #tpu.memory_space<vmem>>, vector<1x16xf32>
      %241 = vector.broadcast %186 : i32 to vector<1x16xi32>
      %242 = arith.cmpi eq, %116, %241 : vector<1x16xi32>
      %243 = vector.broadcast %239 : i1 to vector<1x16xi1>
      %244 = arith.andi %242, %243 : vector<1x16xi1>
      %cst_105 = arith.constant 0.000000e+00 : f32
      %245 = vector.broadcast %cst_105 : f32 to vector<1x16xf32>
      %246 = arith.select %244, %237, %245 : vector<1x16xi1>, vector<1x16xf32>
      %247 = vector.broadcast %229 : f32 to vector<1x16xf32>
      %248 = arith.mulf %247, %246 : vector<1x16xf32>
      %249 = arith.addf %240, %248 : vector<1x16xf32>
      %c0_106 = arith.constant 0 : index
      %c0_107 = arith.constant 0 : index
      %250 = vector.load %arg13[%c0_106, %c0_107] : memref<1x16xf32, #tpu.memory_space<vmem>>, vector<1x16xf32>
      tpu.vector_store %arg13[%c0_106, %c0_107], %249 {strides = array<i32>} : memref<1x16xf32, #tpu.memory_space<vmem>>, vector<1x16xf32>,
      %c0_108 = arith.constant 0 : index
      %c0_109 = arith.constant 0 : index
      %251 = vector.load %arg15[%c0_108, %c0_109] : memref<1x16xf32, #tpu.memory_space<vmem>>, vector<1x16xf32>
      %252 = arith.andi %213, %187 : i1
      %253 = vector.broadcast %252 : i1 to vector<1x16xi1>
      %254 = arith.andi %192, %253 : vector<1x16xi1>
      %cst_110 = arith.constant 1.000000e+00 : f32
      %cst_111 = arith.constant 0.000000e+00 : f32
      %255 = vector.broadcast %cst_110 : f32 to vector<1x16xf32>
      %256 = vector.broadcast %cst_111 : f32 to vector<1x16xf32>
      %257 = arith.select %254, %255, %256 : vector<1x16xi1>, vector<1x16xf32>
      %258 = arith.addf %251, %257 : vector<1x16xf32>
      %c0_112 = arith.constant 0 : index
      %c0_113 = arith.constant 0 : index
      %259 = vector.load %arg15[%c0_112, %c0_113] : memref<1x16xf32, #tpu.memory_space<vmem>>, vector<1x16xf32>
      tpu.vector_store %arg15[%c0_112, %c0_113], %258 {strides = array<i32>} : memref<1x16xf32, #tpu.memory_space<vmem>>, vector<1x16xf32>,
      %cst_114 = arith.constant 1.000000e+00 : f32
      %260 = vector.broadcast %cst_114 : f32 to vector<1x16xf32>
      %261 = arith.subf %260, %196 : vector<1x16xf32>
      %cst_115 = arith.constant 1.000000e+00 : f32
      %262 = vector.broadcast %cst_115 : f32 to vector<1x16xf32>
      %263 = arith.select %206, %261, %262 : vector<1x16xi1>, vector<1x16xf32>
      %264 = math.log %263 : vector<1x16xf32>
      %cst_116 = arith.constant 0.000000e+00 : f32
      %265 = vector.broadcast %cst_116 : f32 to vector<1x16xf32>
      %266 = arith.subf %265, %264 : vector<1x16xf32>
      %267 = arith.mulf %266, %113 : vector<1x16xf32>
      %c0_i32_117 = arith.constant 0 : i32
      %268 = arith.cmpi sgt, %223, %c0_i32_117 : i32
      %269 = arith.andi %213, %268 : i1
      %c1_i32_118 = arith.constant 1 : i32
      %270 = arith.maxsi %223, %c1_i32_118 : i32
      %271 = arith.sitofp %270 : i32 to f32
      %cst_119 = arith.constant 1.000000e+00 : f32
      %272 = arith.divf %cst_119, %271 : f32
      %273 = vector.broadcast %269 : i1 to vector<1x16xi1>
      %274 = arith.andi %206, %273 : vector<1x16xi1>
      %c0_120 = arith.constant 0 : index
      %c0_121 = arith.constant 0 : index
      %275 = vector.load %arg14[%c0_120, %c0_121] : memref<1x16xf32, #tpu.memory_space<vmem>>, vector<1x16xf32>
      %cst_122 = arith.constant 0.000000e+00 : f32
      %276 = vector.broadcast %cst_122 : f32 to vector<1x16xf32>
      %277 = arith.select %274, %267, %276 : vector<1x16xi1>, vector<1x16xf32>
      %278 = vector.broadcast %272 : f32 to vector<1x16xf32>
      %279 = arith.mulf %278, %277 : vector<1x16xf32>
      %280 = arith.addf %275, %279 : vector<1x16xf32>
      %c0_123 = arith.constant 0 : index
      %c0_124 = arith.constant 0 : index
      %281 = vector.load %arg14[%c0_123, %c0_124] : memref<1x16xf32, #tpu.memory_space<vmem>>, vector<1x16xf32>
      tpu.vector_store %arg14[%c0_123, %c0_124], %280 {strides = array<i32>} : memref<1x16xf32, #tpu.memory_space<vmem>>, vector<1x16xf32>,
      %c0_125 = arith.constant 0 : index
      %c0_126 = arith.constant 0 : index
      %282 = vector.load %arg16[%c0_125, %c0_126] : memref<1x16xf32, #tpu.memory_space<vmem>>, vector<1x16xf32>
      %cst_127 = arith.constant 1.000000e+00 : f32
      %cst_128 = arith.constant 0.000000e+00 : f32
      %283 = vector.broadcast %cst_127 : f32 to vector<1x16xf32>
      %284 = vector.broadcast %cst_128 : f32 to vector<1x16xf32>
      %285 = arith.select %274, %283, %284 : vector<1x16xi1>, vector<1x16xf32>
      %286 = arith.addf %282, %285 : vector<1x16xf32>
      %c0_129 = arith.constant 0 : index
      %c0_130 = arith.constant 0 : index
      %287 = vector.load %arg16[%c0_129, %c0_130] : memref<1x16xf32, #tpu.memory_space<vmem>>, vector<1x16xf32>
      tpu.vector_store %arg16[%c0_129, %c0_130], %286 {strides = array<i32>} : memref<1x16xf32, #tpu.memory_space<vmem>>, vector<1x16xf32>,
      %true = arith.constant true
      %288 = arith.xori %187, %true : i1
      %289 = arith.andi %213, %288 : i1
      %290 = arith.select %289, %181, %186 : i32
      %291 = arith.index_cast %184 : i32 to index
      %292 = memref.load %arg17[%291] : memref<8xi32, #tpu.memory_space<smem>>
      memref.store %290, %arg17[%291] : memref<8xi32, #tpu.memory_space<smem>>
      %293 = arith.ori %192, %201 : vector<1x16xi1>
      %294 = vector.broadcast %213 : i1 to vector<1x16xi1>
      %295 = arith.andi %293, %294 : vector<1x16xi1>
      %c0_i32_131 = arith.constant 0 : i32
      %296 = vector.broadcast %c0_i32_131 : i32 to vector<1x16xi32>
      %297 = arith.select %295, %296, %188 : vector<1x16xi1>, vector<1x16xi32>
      %c0_132 = arith.constant 0 : index
      %c0_133 = arith.constant 0 : index
      %298 = vector.load %arg12[%c0_132, %c0_133] : memref<1x16xi32, #tpu.memory_space<vmem>>, vector<1x16xi32>
      tpu.vector_store %arg12[%c0_132, %c0_133], %297 {strides = array<i32>} : memref<1x16xi32, #tpu.memory_space<vmem>>, vector<1x16xi32>,
    }
    %c0_65 = arith.constant 0 : index
    %c0_66 = arith.constant 0 : index
    %143 = vector.load %arg13[%c0_65, %c0_66] : memref<1x16xf32, #tpu.memory_space<vmem>>, vector<1x16xf32>
    %144 = vector.shape_cast %143 : vector<1x16xf32> to vector<1x1x16xf32>
    %cst_67 = arith.constant dense<0.000000e+00> : vector<1xf32>
    %145 = vector.multi_reduction <add>, %144, %cst_67 [1, 2] : vector<1x1x16xf32> to vector<1xf32>
    %146 = vector.shape_cast %145 : vector<1xf32> to vector<1x1x1xf32>
    %147 = vector.extract %146[0, 0, 0] : f32 from vector<1x1x1xf32>
    %c0_68 = arith.constant 0 : index
    %c0_69 = arith.constant 0 : index
    %148 = vector.load %arg14[%c0_68, %c0_69] : memref<1x16xf32, #tpu.memory_space<vmem>>, vector<1x16xf32>
    %149 = vector.shape_cast %148 : vector<1x16xf32> to vector<1x1x16xf32>
    %cst_70 = arith.constant dense<0.000000e+00> : vector<1xf32>
    %150 = vector.multi_reduction <add>, %149, %cst_70 [1, 2] : vector<1x1x16xf32> to vector<1xf32>
    %151 = vector.shape_cast %150 : vector<1xf32> to vector<1x1x1xf32>
    %152 = vector.extract %151[0, 0, 0] : f32 from vector<1x1x1xf32>
    %c0_71 = arith.constant 0 : index
    %c0_72 = arith.constant 0 : index
    %153 = vector.load %arg15[%c0_71, %c0_72] : memref<1x16xf32, #tpu.memory_space<vmem>>, vector<1x16xf32>
    %154 = vector.shape_cast %153 : vector<1x16xf32> to vector<1x1x16xf32>
    %cst_73 = arith.constant dense<0.000000e+00> : vector<1xf32>
    %155 = vector.multi_reduction <add>, %154, %cst_73 [1, 2] : vector<1x1x16xf32> to vector<1xf32>
    %156 = vector.shape_cast %155 : vector<1xf32> to vector<1x1x1xf32>
    %157 = vector.extract %156[0, 0, 0] : f32 from vector<1x1x1xf32>
    %c0_74 = arith.constant 0 : index
    %c0_75 = arith.constant 0 : index
    %158 = vector.load %arg16[%c0_74, %c0_75] : memref<1x16xf32, #tpu.memory_space<vmem>>, vector<1x16xf32>
    %159 = vector.shape_cast %158 : vector<1x16xf32> to vector<1x1x16xf32>
    %cst_76 = arith.constant dense<0.000000e+00> : vector<1xf32>
    %160 = vector.multi_reduction <add>, %159, %cst_76 [1, 2] : vector<1x1x16xf32> to vector<1xf32>
    %161 = vector.shape_cast %160 : vector<1xf32> to vector<1x1x1xf32>
    %162 = vector.extract %161[0, 0, 0] : f32 from vector<1x1x1xf32>
    %cst_77 = arith.constant 9.99999997E-7 : f32
    %163 = arith.addf %157, %cst_77 : f32
    %164 = arith.divf %147, %163 : f32
    %cst_78 = arith.constant 9.99999997E-7 : f32
    %165 = arith.addf %162, %cst_78 : f32
    %166 = arith.divf %152, %165 : f32
    %167 = tpu.iota {dimensions = array<i32: 1>} : vector<1x128xi32>
    %c0_i32_79 = arith.constant 0 : i32
    %168 = vector.broadcast %c0_i32_79 : i32 to vector<1x128xi32>
    %169 = arith.cmpi eq, %167, %168 : vector<1x128xi32>
    %c1_i32_80 = arith.constant 1 : i32
    %170 = vector.broadcast %c1_i32_80 : i32 to vector<1x128xi32>
    %171 = arith.cmpi eq, %167, %170 : vector<1x128xi32>
    %cst_81 = arith.constant 0.000000e+00 : f32
    %172 = vector.broadcast %164 : f32 to vector<1x128xf32>
    %173 = vector.broadcast %cst_81 : f32 to vector<1x128xf32>
    %174 = arith.select %171, %172, %173 : vector<1x128xi1>, vector<1x128xf32>
    %175 = vector.broadcast %166 : f32 to vector<1x128xf32>
    %176 = arith.select %169, %175, %174 : vector<1x128xi1>, vector<1x128xf32>
    %c0_82 = arith.constant 0 : index
    %c0_83 = arith.constant 0 : index
    %c0_84 = arith.constant 0 : index
    %177 = vector.load %arg9[%c0_82, %c0_83, %c0_84] : memref<1x1x128xf32, #tpu.memory_space<vmem>>, vector<1x1x128xf32>
    %178 = vector.shape_cast %177 : vector<1x1x128xf32> to vector<1x128xf32>
    %179 = vector.shape_cast %176 : vector<1x128xf32> to vector<1x1x128xf32>
    tpu.vector_store %arg9[%c0_82, %c0_83, %c0_84], %179 {strides = array<i32>} : memref<1x1x128xf32, #tpu.memory_space<vmem>>, vector<1x1x128xf32>,
    return
  }
  func.func @transform_0(%arg0: i32, %arg1: memref<2xi32, #tpu.memory_space<smem>>, %arg2: memref<2x16xi32, #tpu.memory_space<smem>>) -> (i32, i32, i32) {
    %c0_i32 = arith.constant 0 : i32
    %c0_i32_0 = arith.constant 0 : i32
    %c0_i32_1 = arith.constant 0 : i32
    return %arg0, %c0_i32, %c0_i32_0 : i32, i32, i32
  }
  func.func @transform_1(%arg0: i32, %arg1: memref<2xi32, #tpu.memory_space<smem>>, %arg2: memref<2x16xi32, #tpu.memory_space<smem>>) -> (i32, i32, i32) {
    %c0_i32 = arith.constant 0 : i32
    %c0_i32_0 = arith.constant 0 : i32
    %c0_i32_1 = arith.constant 0 : i32
    return %arg0, %c0_i32, %c0_i32_0 : i32, i32, i32
  }
  func.func @transform_2(%arg0: i32, %arg1: memref<2xi32, #tpu.memory_space<smem>>, %arg2: memref<2x16xi32, #tpu.memory_space<smem>>) -> (i32, i32, i32) {
    %c0_i32 = arith.constant 0 : i32
    %c0_i32_0 = arith.constant 0 : i32
    %c0_i32_1 = arith.constant 0 : i32
    return %arg0, %c0_i32, %c0_i32_0 : i32, i32, i32
  }
  func.func @transform_3(%arg0: i32, %arg1: memref<2xi32, #tpu.memory_space<smem>>, %arg2: memref<2x16xi32, #tpu.memory_space<smem>>) -> (i32, i32, i32) {
    %c0_i32 = arith.constant 0 : i32
    %c0_i32_0 = arith.constant 0 : i32
    %c0_i32_1 = arith.constant 0 : i32
    return %arg0, %c0_i32, %c0_i32_0 : i32, i32, i32
  }
  func.func @transform_4(%arg0: i32, %arg1: memref<2xi32, #tpu.memory_space<smem>>, %arg2: memref<2x16xi32, #tpu.memory_space<smem>>) -> (i32, i32, i32) {
    %c0_i32 = arith.constant 0 : i32
    %c0_i32_0 = arith.constant 0 : i32
    %c0_i32_1 = arith.constant 0 : i32
    return %arg0, %c0_i32, %c0_i32_0 : i32, i32, i32
  }
  func.func @transform_5(%arg0: i32, %arg1: memref<2xi32, #tpu.memory_space<smem>>, %arg2: memref<2x16xi32, #tpu.memory_space<smem>>) -> (i32, i32, i32) {
    %c0_i32 = arith.constant 0 : i32
    %c0_i32_0 = arith.constant 0 : i32
    %c0_i32_1 = arith.constant 0 : i32
    return %arg0, %c0_i32, %c0_i32_0 : i32, i32, i32
  }
  func.func @transform_6(%arg0: i32, %arg1: memref<2xi32, #tpu.memory_space<smem>>, %arg2: memref<2x16xi32, #tpu.memory_space<smem>>) -> (i32, i32, i32) {
    %c0_i32 = arith.constant 0 : i32
    %c0_i32_0 = arith.constant 0 : i32
    %c0_i32_1 = arith.constant 0 : i32
    return %arg0, %c0_i32, %c0_i32_0 : i32, i32, i32
  }
}

</mosaic_0001>

<bundles_post_ra>
// kernel: tpu_custom_call.1
= control target key start
LH: loop header
LB: loop body
LE: loop exit
PB: predicated region body
PF: predicated region fallthrough
CT: control target
= control target key end

     0   :  { %s1511_s0 = inlined_call_operand.vmem [shape: s32[2], index: 0, kind: input, shape index: {}]   ;;  %s1512_s2 = inlined_call_operand.vmem [shape: f32[2,16,4], index: 2, kind: input, shape index: {}]   ;;  %s1513_s3 = inlined_call_operand.vmem [shape: f32[2,4,16], index: 3, kind: input, shape index: {}]   ;;  %s1514_s4 = inlined_call_operand.vmem [shape: f32[2,4,16], index: 4, kind: input, shape index: {}]   ;;  %s1515_s5 = inlined_call_operand.vmem [shape: f32[2,8,4], index: 5, kind: input, shape index: {}]   ;;  %s1516_s6 = inlined_call_operand.vmem [shape: f32[2,1,16], index: 6, kind: input, shape index: {}]   ;;  %s1517_s7 = inlined_call_operand.vmem [shape: s32[2,1,16], index: 7, kind: input, shape index: {}]   ;;  %s1518_s8 = inlined_call_operand.hbm [shape: f32[2,1,128], index: 8, kind: output, shape index: {}]   ;;  %s1519_s1 = inlined_call_operand.vmem [shape: s32[2,16], index: 1, kind: input, shape index: {}]  }
   0x1   :  { %s13_s29 = sshll.u32 %s1511_s0, 4  ;;  %s17_s10 = sshll.u32 %s1519_s1, 4  ;;  %s14_s29 = int_to_ptr.vmem [resolvable:$true] %s13_s29  ;;  %s18_s10 = int_to_ptr.vmem [resolvable:$true] %s17_s10 }
   0x2   :  { %s1078_s11 = scalar_lea.vmem %s14_s29, 16  ;;  %p1083_p1 = scmp.lt.s32.totalorder %s14_s29, %s14_s29 }
   0x3   :  { %p1079_p0 = scmp.ne.s32.totalorder %s14_s29, %s1078_s11  ;;  %p1084_p2 = scmp.lt.s32.totalorder %s1078_s11, %s1078_s11 }
   0x5   :  { %p1085_p3 = por %p1084_p2, %p1083_p1 }
   0x7   :  { %p1086_p4 = pnand %p1085_p3, %p1079_p0 }
   0x9   :  { %1089 = shalt.err (!%p1086_p4)  }
   0xa   :  { %s1174_s12 = smov [#allocation11]   ;;  %s1090_s13 = scalar_lea.vmem %s18_s10, 32 }
   0xb   :  { %16 = dma.vmem_to_smem %s14_s29, 16, %s1174_s12, [#allocation10] }
   0xc   :  { %p1091_p5 = scmp.ne.s32.totalorder %s18_s10, %s1090_s13  ;;  %p1095_p6 = scmp.lt.s32.totalorder %s18_s10, %s18_s10 }
   0xd   :  { %p1096_p7 = scmp.lt.s32.totalorder %s1090_s13, %s1090_s13 }
   0xf   :  { %p1097_p8 = por %p1096_p7, %p1095_p6 }
  0x11   :  { %p1098_p9 = pnand %p1097_p8, %p1091_p5 }
  0x13   :  { %1101 = shalt.err (!%p1098_p9)  }
  0x14   :  { %s1175_s0 = smov [#allocation12]  }
  0x15   :  { %20 = dma.vmem_to_smem %s18_s10, 32, %s1175_s0, [#allocation10] }
  0x16   :  { %1148 = dma.done.wait [#allocation10], 48 }
  0x17   :  { %1149 = vsyncadd [#allocation10], 4294967248 }
  0x18   :  { %22 = sfence }
  0x19   :  { %23 = vsyncpa [#allocation14], 0 }
  0x1a   :  { %25 = vsyncpa [#allocation14 + $0x1], 0  ;;  %s1239_s1 = smov 0   ;;  %s1241_s14 = smov 0  }
  0x1b   :  { %s1243_s15 = smov 0   ;;  %s1245_s16 = smov 0  }
  0x1c LB: > { %s1260_s17 = sadd.s32 4294967295, %s1168_s16   ;;  %s949_s18 = sadd.s32 4294967294, %s1168_s16   ;;  %s1168_s16 = sphi %s1245_s16, %s1536_s16   ;;  %s1164_s15 = sphi %s1243_s15, %s1535_s15   ;;  %s1160_s14 = sphi %s1241_s14, %s1534_s14   ;;  %s1156_s1 = sphi %s1239_s1, %s1533_s1  }
  0x1d   : > { %s1264_s19 = sadd.s32 1, %s1168_s16   ;;  %s194_s20 = sadd.s32 1, %s1164_s15 }
  0x1e   : > { %s191_s21 = ssub.s32 %s1168_s16, %s1264_s19  ;;  %p204_p10 = scmp.ne.s32.totalorder %s1164_s15, %s1160_s14 }
  0x1f   : > { %p192_p11 = scmp.eq.s32.totalorder %s191_s21, 0  ;;  %p205_p12 = scmp.eq.s32.totalorder %s1260_s17, 1 }
  0x20   : > { %p210_p13 = scmp.ne.s32.totalorder %s1160_s14, %s1156_s1  ;;  %p211_p0 = scmp.eq.s32.totalorder %s949_s18, 1 }
  0x21   : > { %s1275_s22 = scalar_select %p192_p11, %s1164_s15, %s194_s20  }
  0x22   : > { %p1277_p1 = por %p205_p12, %p204_p10  ;;  %p1281_p2 = por %p211_p0, %p210_p13 }
  0x23   : > { %p952_p3 = scmp.ge.s32.totalorder %s1168_s16, 1  ;;  %p270_p4 = scmp.lt.s32.totalorder %s1168_s16, 3 }
  0x25   : > { %p271_p5 = pnand %p952_p3, %p270_p4 }
  0x26   : > { %p317_p6 = scmp.lt.s32.totalorder (!%p271_p5), %s1260_s17, 1  ;;  %s1311_s18 = sld [smem:[#allocation11 + %s1260_s17]] (!%p271_p5) }
  0x27   : > { %274 = sbr.rel (%p271_p5) target bundleno = 1041 (0x411), region = 44  ;;  %s1177_s20 = smov (!%p271_p5), 2  }
  0x28   : > { %s1183_s30 = smov (!%p271_p5), 4294967295  }
  0x29   : > { %563 = sst [smem:[#allocation9]] (!%p271_p5), %s1183_s30 }
  0x2a   : > { %565 = sst [smem:[#allocation9 + $0x1]] (!%p271_p5), %s1183_s30 }
  0x2b   : > { %567 = sst [smem:[#allocation9 + $0x2]] (!%p271_p5), %s1183_s30 }
  0x2c   : > { %s1289_s25 = scalar_select %p317_p6, %s1260_s17, 1  ;;  %v1176_v0 = vmov 2   ;;  %v354_v4 = vlaneseq  ;;  %vm556_vm0 = vcmask 122880   ;;  %v1178_v7 = vmov 0.0  }
  0x2d   : > { %1051 = vset.pattern.permute.xlu1 %v1176_v0  ;;  %1050 = vset.pattern.permute.xlu0 %v1176_v0  ;;  %558 = vst.msk [vmem:[#allocation5] sm:$0x1] %vm556_vm0, %v1178_v7  ;;  %559 = vst.msk [vmem:[#allocation6] sm:$0x1] %vm556_vm0, %v1178_v7  ;;  %v553_v9 = vstv %s1311_s18  ;;  %v1179_v10 = vmov 0   ;;  %v1181_v21 = vmov 1  }
  0x2e   : > { %s967_s26 = sshll.u32 %s1289_s25, 4  ;;  %s336_s29 = scalar_lea.vmem %s1516_s6, %s1289_s25  ;;  %560 = vst.msk [vmem:[#allocation7] sm:$0x1] %vm556_vm0, %v1178_v7  ;;  %561 = vst.msk [vmem:[#allocation8] sm:$0x1] %vm556_vm0, %v1178_v7  ;;  %v1321_v8 = vand.u32 127, %v354_v4 }
  0x2f   : > { %s321_s10 = scalar_lea.vmem %s1512_s2, %s967_s26  ;;  %s339_s13 = scalar_lea.vmem %s1517_s7, %s1289_s25  ;;  %v1305_v1 = vld [vmem:[%s336_s29] sm:$0x1]  ;;  %v1182_v22 = vmov 3   ;;  %v355_v33 = vshrl.u32 %v354_v4, 7  ;;  %vm467_vm2 = vcmask 130048  }
  0x30   : > { %v341_v2 = vld [vmem:[%s321_s10] sm:$0xff]  ;;  %s957_s0 = sshll.u32 %s1289_s25, 3  ;;  %v342_v6 = vld [vmem:[%s321_s10 + $0x8] sm:$0xff]  ;;  %vm554_vm1 = vcmp.lt.s32.totalorder %v1321_v8, %v553_v9  ;;  %s1180_s26 = smov 127  }
  0x31   : > { %v1307_v3 = vld [vmem:[%s339_s13] sm:$0x1]  ;;  %416 = vrot.lane.b32.xlu0 %v341_v2, %s1177_s20  ;;  %s333_s28 = scalar_lea.vmem %s1515_s5, %s957_s0  ;;  %v555_v11 = vsel %vm554_vm1, 1, %v1179_v10  ;;  %s315_s29 = sand.u32 1, %s1160_s14   ;;  %v1335_v38 = vsub.s32 2, %v355_v33  ;;  %v370_v39 = vsub.s32 0, %v355_v33 }
  0x32   : > { %v470_v5 = vld [vmem:[%s333_s28] sm:$0xff]  ;;  %557 = vst.msk [vmem:[#allocation4] sm:$0x1] %vm556_vm0, %v555_v11  ;;  %569 = sst [smem:[#allocation9 + $0x3]] %s1183_s30  ;;  %s955_s9 = sshll.u32 %s1289_s25, 2  ;;  %v390_v40 = vsub.s32 3, %v355_v33 }
  0x33   : > { %516 = vrot.lane.b32.xlu1 %v470_v5, %s1177_s20  ;;  %571 = sst [smem:[#allocation9 + $0x4]] %s1183_s30  ;;  %s325_s12 = scalar_lea.vmem %s1513_s3, %s955_s9  ;;  %v404_v41 = vsub.s32 1, %v355_v33 }
  0x34   : > { %573 = sst [smem:[#allocation9 + $0x5]] %s1183_s30  ;;  %v343_v35 = vld [vmem:[%s325_s12] sm:$0xf]  ;;  %s329_s0 = scalar_lea.vmem %s1514_s4, %s955_s9 }
  0x35   : > { %418 = vrot.lane.b32.xlu0 %v342_v6, %s1177_s20  ;;  %575 = sst [smem:[#allocation9 + $0x6]] %s1183_s30  ;;  %v437_v37 = vrot.slane %v343_v35, 6  ;;  %v357_v45 = vrot.slane %v343_v35, %v1335_v38  ;;  %v371_v46 = vrot.slane %v343_v35, %v370_v39  ;;  %v391_v47 = vrot.slane %v343_v35, %v390_v40  ;;  %v471_v49 = vld [vmem:[%s329_s0] sm:$0xf]  ;;  %s1346_s20 = scalar_lea.vmem [#allocation13], %s315_s29 }
  0x36   : > { %577 = sst [smem:[#allocation9 + $0x7]] %s1183_s30  ;;  %v405_v48 = vrot.slane %v343_v35, %v404_v41  ;;  %v527_v53 = vrot.slane %v471_v49, 6  ;;  %v480_v4 = vrot.slane %v471_v49, %v1335_v38  ;;  %v489_v7 = vrot.slane %v471_v49, %v370_v39  ;;  %p958_p7 = scmp.le.s32.totalorder %s1311_s18, 0 }
  0x37   : > { %v439_v44 = vsub.f32 %v343_v35, %v437_v37  ;;  %s1349_s21 = smov (!%p958_p7), 0  }
  0x38   : > { %v529_v61 = vsub.f32 %v471_v49, %v527_v53 }
  0x39   : > { %v440_v52 = vadd.f32 1.0, %v439_v44 }
  0x3b   : > { %v442_v60 = vrot.slane %v440_v52, 1 }
  0x3d   : > { %v444_v11 = vmul.f32 %v442_v60, %v440_v52 }
  0xa3   : > { %v417_v12 = vpop.permute.xlu0 %416 }
  0xa4   : > { %v422_v13 = vsub.f32 %v341_v2, %v417_v12  ;;  %v530_v12 = vadd.f32 1.0, %v529_v61 }
  0xa5   : > { %v517_v14 = vpop.permute.xlu1 %516 }
  0xa6   : > { %v424_v15 = vadd.f32 1.0, %v422_v13  ;;  %v519_v16 = vsub.f32 %v470_v5, %v517_v14 }
  0xa7   : > { %v419_v17 = vpop.permute.xlu0 %418 }
  0xa8   : > { %v520_v18 = vadd.f32 1.0, %v519_v16  ;;  %v423_v19 = vsub.f32 %v342_v6, %v419_v17  ;;  %428 = vrot.lane.b32.xlu1 %v424_v15, %s1180_s26 }
  0xaa   : > { %v425_v20 = vadd.f32 1.0, %v423_v19 }
  0xac   : > { %522 = vrot.lane.b32.xlu1 %v520_v18, %s1180_s26  ;;  %430 = vrot.lane.b32.xlu0 %v425_v20, %s1180_s26 }
  0xb0   : > { %351 = vperm.xlu1 %1051, %v342_v6   ;;  %346 = vperm.xlu0 %1050, %v341_v2  }
  0xb4   : > { %1052 = vset.pattern.permute.xlu1 %v1179_v10  ;;  %1054 = vset.pattern.permute.xlu0 %v1181_v21 }
  0xb5   : > { %361 = vperm.xlu1 %1052, %v341_v2   ;;  %395 = vperm.xlu0 %1054, %v341_v2  }
  0xb9   : > { %1053 = vset.pattern.permute.xlu1 %v1182_v22  ;;  %1055 = vset.pattern.permute.xlu0 %v1179_v10 }
  0xba   : > { %381 = vperm.xlu1 %1053, %v341_v2   ;;  %365 = vperm.xlu0 %1055, %v342_v6  }
  0xbe   : > { %385 = vperm.xlu1 %1053, %v342_v6   ;;  %483 = vperm.xlu0 %1055, %v470_v5  }
  0xc2   : > { %1056 = vset.pattern.permute.xlu1 %v1181_v21  ;;  %1060 = vset.pattern.permute.xlu0 %v1176_v0 }
  0xc3   : > { %399 = vperm.xlu1 %1056, %v342_v6   ;;  %v510_v6 = vrot.slane %v471_v49, %v404_v41 }
  0xc7   : > { %1057 = vset.pattern.permute.xlu1 %v1176_v0 }
  0xc8   : > { %474 = vperm.xlu1 %1057, %v470_v5  }
  0xcc   : > { %1058 = vset.pattern.permute.xlu1 %v1182_v22 }
  0xcd   : > { %495 = vperm.xlu1 %1058, %v470_v5  }
  0xd1   : > { %1059 = vset.pattern.permute.xlu1 %v1181_v21 }
  0xd2   : > { %504 = vperm.xlu1 %1059, %v470_v5   ;;  %v501_v5 = vrot.slane %v471_v49, %v390_v40 }
  0xd6   : > { %1061 = vset.pattern.permute.xlu1 %v1176_v0 }
 0x11a   : > { %v429_v23 = vpop.permute.xlu1 %428 }
 0x11b   : > { %v434_v24 = vmul.f32 %v429_v23, %v424_v15  ;;  %v458_v23 = vrot.slane %v444_v11, %v1335_v38 }
 0x11d   : > { %447 = vperm.xlu0 %1060, %v434_v24   ;;  %v532_v24 = vrot.slane %v530_v12, 1 }
 0x11e   : > { %v431_v25 = vpop.permute.xlu0 %430  ;;  %v523_v27 = vpop.permute.xlu1 %522 }
 0x11f   : > { %v435_v26 = vmul.f32 %v431_v25, %v425_v20  ;;  %v525_v28 = vmul.f32 %v523_v27, %v520_v18 }
 0x121   : > { %452 = vperm.xlu1 %1061, %v435_v26  }
 0x125   : > { %537 = vperm.xlu1 %1061, %v525_v28  }
 0x12b   : > { %v352_v29 = vpop.permute.xlu1 %351  ;;  %v347_v34 = vpop.permute.xlu0 %346 }
 0x12c   : > { %v358_v51 = vmin.f32 %v347_v34, %v357_v45  ;;  %v359_v58 = vmin.f32 %v352_v29, %v357_v45 }
 0x130   : > { %v362_v30 = vpop.permute.xlu1 %361  ;;  %v396_v43 = vpop.permute.xlu0 %395 }
 0x131   : > { %v372_v50 = vmax.f32 %v362_v30, %v371_v46  ;;  %v406_v55 = vmax.f32 %v396_v43, %v405_v48 }
 0x133   : > { %v374_v59 = vsub.f32 %v358_v51, %v372_v50 }
 0x135   : > { %v382_v31 = vpop.permute.xlu1 %381  ;;  %v366_v57 = vpop.permute.xlu0 %365  ;;  %v376_v13 = vadd.f32 1.0, %v374_v59 }
 0x136   : > { %v392_v54 = vmin.f32 %v382_v31, %v391_v47  ;;  %v373_v2 = vmax.f32 %v366_v57, %v371_v46 }
 0x137   : > { %v378_v25 = vmax.f32 %v376_v13, 0.0 }
 0x138   : > { %v408_v63 = vsub.f32 %v392_v54, %v406_v55  ;;  %v375_v16 = vsub.f32 %v359_v58, %v373_v2 }
 0x139   : > { %v386_v32 = vpop.permute.xlu1 %385  ;;  %v484_v10 = vpop.permute.xlu0 %483 }
 0x13a   : > { %v393_v62 = vmin.f32 %v386_v32, %v391_v47  ;;  %v410_v14 = vadd.f32 1.0, %v408_v63  ;;  %v490_v20 = vmax.f32 %v484_v10, %v489_v7  ;;  %v377_v22 = vadd.f32 1.0, %v375_v16 }
 0x13b   : > { %v534_v32 = vmul.f32 %v532_v24, %v530_v12 }
 0x13c   : > { %v412_v26 = vmax.f32 %v410_v14, 0.0  ;;  %v379_v30 = vmax.f32 %v377_v22, 0.0 }
 0x13d   : > { %v543_v41 = vrot.slane %v534_v32, %v1335_v38 }
 0x13e   : > { %v400_v36 = vpop.permute.xlu1 %399  ;;  %v414_v35 = vmul.f32 %v412_v26, %v378_v25 }
 0x13f   : > { %v407_v0 = vmax.f32 %v400_v36, %v405_v48 }
 0x141   : > { %v409_v15 = vsub.f32 %v393_v62, %v407_v0 }
 0x143   : > { %v475_v42 = vpop.permute.xlu1 %474  ;;  %v411_v21 = vadd.f32 1.0, %v409_v15 }
 0x144   : > { %v481_v17 = vmin.f32 %v475_v42, %v480_v4 }
 0x145   : > { %v413_v29 = vmax.f32 %v411_v21, 0.0 }
 0x146   : > { %v491_v28 = vsub.f32 %v481_v17, %v490_v20 }
 0x147   : > { %v415_v40 = vmul.f32 %v413_v29, %v379_v30 }
 0x148   : > { %v496_v56 = vpop.permute.xlu1 %495  ;;  %v492_v34 = vadd.f32 1.0, %v491_v28 }
 0x149   : > { %v502_v18 = vmin.f32 %v496_v56, %v501_v5 }
 0x14a   : > { %v493_v43 = vmax.f32 %v492_v34, 0.0 }
 0x14d   : > { %v505_v9 = vpop.permute.xlu1 %504 }
 0x14e   : > { %v511_v19 = vmax.f32 %v505_v9, %v510_v6 }
 0x150   : > { %v512_v27 = vsub.f32 %v502_v18, %v511_v19 }
 0x152   : > { %v513_v33 = vadd.f32 1.0, %v512_v27 }
 0x154   : > { %v514_v42 = vmax.f32 %v513_v33, 0.0 }
 0x156   : > { %v515_v47 = vmul.f32 %v514_v42, %v493_v43 }
 0x198   : > { %v448_v31 = vpop.permute.xlu0 %447 }
 0x199   : > { %v459_v36 = vadd.f32 %v458_v23, %v448_v31 }
 0x19b   : > { %v461_v37 = vsub.f32 %v459_v36, %v414_v35 }
 0x19c   : > { %v453_v39 = vpop.permute.xlu1 %452 }
 0x19d   : > { %1062 = vrcp.f32 %v461_v37  ;;  %v460_v44 = vadd.f32 %v458_v23, %v453_v39 }
 0x19f   : > { %v462_v45 = vsub.f32 %v460_v44, %v415_v40 }
 0x1a0   : > { %v538_v46 = vpop.permute.xlu1 %537 }
 0x1a1   : > { %1064 = vrcp.f32 %v462_v45  ;;  %v544_v48 = vadd.f32 %v543_v41, %v538_v46 }
 0x1a3   : > { %v545_v49 = vsub.f32 %v544_v48, %v515_v47 }
 0x1a5   : > { %1066 = vrcp.f32 %v545_v49 }
 0x1aa   : > { %v1063_v50 = vpop.eup %1062 }
 0x1ab   : > { %v464_v51 = vmul.f32 %v1063_v50, %v414_v35 }
 0x1ad   : > { %468 = vst.msk [vmem:[#allocation2] sm:$0xff] %vm467_vm2, %v464_v51 }
 0x1ae   : > { %v1065_v52 = vpop.eup %1064 }
 0x1af   : > { %v466_v53 = vmul.f32 %v1065_v52, %v415_v40 }
 0x1b1   : > { %469 = vst.msk [vmem:[#allocation2 + $0x8] sm:$0xff] %vm467_vm2, %v466_v53  ;;  %895 = sbr.rel (%p958_p7) target bundleno = 742 (0x2e6), region = 106 }
 0x1b2   : > { %v1067_v38 = vpop.eup %1066 }
 0x1b3   : > { %v547_v54 = vmul.f32 %v1067_v38, %v515_v47 }
 0x1b5   : > { %548 = vst.msk [vmem:[#allocation3] sm:$0xff] %vm467_vm2, %v547_v54 }
 0x1b6 LB: >> { %v1354_v55 = vld [vmem:[#allocation4] sm:$0x1]  ;;  %v596_v56 = vstv %s1172_s21  ;;  %s584_s27 = sshra.s32 %s1172_s21, 7  ;;  %s589_s28 = sand.u32 127, %s1172_s21  ;;  %vm1184_vm5 = vmmov 1   ;;  %v1185_v0 = vmov 0   ;;  %s1172_s21 = sphi %s1349_s21, %s581_s21  }
 0x1b7   : >> { %vm595_vm3 = vcmp.gt.s32.totalorder %v1354_v55, 0  ;;  %vm1361_vm4 = vcmp.eq.s32.totalorder %v1321_v8, %v596_v56  ;;  %s586_s26 = sadd.s32 %s1260_s17, %s584_s27  ;;  %s600_s10 = scalar_lea.vmem [#allocation2], %s1172_s21 }
 0x1b8   : >> { %v611_v58 = vsel %vm1361_vm4, %v1354_v55, 0  ;;  %s959_s30 = sshll.u32 %s586_s26, 7  ;;  %vm598_vm6 = vmxor %vm1361_vm4, %vm1184_vm5  ;;  %v1377_v61 = vld [vmem:[%s600_s10] sm:$0x1]  ;;  %v675_v17 = vsel %vm1361_vm4, %v1305_v1, 0.0 }
 0x1b9   : >> { %v612_v59 = vsel %vm556_vm0, %v611_v58, 0  ;;  %s590_s9 = sadd.s32 %s959_s30, %s589_s28  ;;  %vm1372_vm7 = vmand %vm595_vm3, %vm598_vm6  ;;  %vm604_vm8 = vcmp.gt.f32.partialorder %v1377_v61, 0.5  ;;  %v676_v21 = vsel %vm556_vm0, %v675_v17, 0.0 }
 0x1ba   : >> { %v614_v62 = vshrl.u32 %v612_v59, 16  ;;  %s1379_s11 = sld [smem:[#allocation12 + %s590_s9]]  ;;  %v613_v63 = vand.u32 65535, %v612_v59  ;;  %v633_v2 = vsel %vm1372_vm7, 1, %v1185_v0  ;;  %vm1387_vm9 = vmand %vm1372_vm7, %vm604_vm8 }
 0x1bb   : >> { %v634_v4 = vsel %vm556_vm0, %v633_v2, 0  ;;  %vm751_vm14 = vmor %vm1361_vm4, %vm1387_vm9 }
 0x1bc   : >> { %v616_v5 = vcvt.s32.f32 %v614_v62  ;;  %v615_v6 = vcvt.s32.f32 %v613_v63  ;;  %v636_v7 = vshrl.u32 %v634_v4, 16  ;;  %v635_v10 = vand.u32 65535, %v634_v4 }
 0x1be   : >> { %619 = vadd.xlane.f32.xlu0 %v616_v5  ;;  %617 = vadd.xlane.f32.xlu1 %v615_v6  ;;  %v638_v9 = vcvt.s32.f32 %v636_v7  ;;  %v637_v14 = vcvt.s32.f32 %v635_v10 }
 0x1c0   : >> { %v606_v12 = vstv %s1379_s11  ;;  %s602_s12 = scalar_lea.vmem [#allocation3], %s1379_s11  ;;  %s592_s13 = sld [smem:[#allocation9 + %s1379_s11]] }
 0x1c1   : >> { %vm607_vm10 = vcmp.ne.s32.totalorder %v1307_v3, %v606_v12  ;;  %v603_v13 = vld [vmem:[%s602_s12] sm:$0x1]  ;;  %s749_s30 = scalar_lea.smem [#allocation9], %s1379_s11 }
 0x1c2   : >> { %641 = vadd.xlane.f32.xlu0 %v638_v9  ;;  %vm608_vm11 = vmand %vm1387_vm9, %vm607_vm10  ;;  %vm609_vm12 = vcmp.gt.f32.partialorder %v1377_v61, %v603_v13  ;;  %v686_v9 = vmax.f32 %v1377_v61, 1e-06 }
 0x1c3   : >> { %vm1397_vm13 = vmand %vm608_vm11, %vm609_vm12 }
 0x1c4   : >> { %v654_v16 = vsel %vm1397_vm13, 1, %v1185_v0  ;;  %v687_v10 = vadd.f32 0.5, %v686_v9 }
 0x1c5   : >> { %v655_v18 = vsel %vm556_vm0, %v654_v16, 0 }
 0x1c6   : >> { %639 = vadd.xlane.f32.xlu0 %v637_v14  ;;  %v657_v19 = vshrl.u32 %v655_v18, 16  ;;  %v656_v20 = vand.u32 65535, %v655_v18  ;;  %1068 = vlog2.f32 %v687_v10  ;;  %p745_p8 = scmp.lt.s32.totalorder %s592_s13, 0  ;;  %p593_p9 = scmp.ge.s32.totalorder %s592_s13, 0  ;;  %v695_v17 = vstv %s592_s13  ;;  %v706_v18 = vld [vmem:[#allocation7] sm:$0x1] }
 0x1c7   : >> { %vm696_vm3 = vcmp.eq.s32.totalorder %v1321_v8, %v695_v17 }
 0x1c8   : >> { %v659_v22 = vcvt.s32.f32 %v657_v19  ;;  %v658_v23 = vcvt.s32.f32 %v656_v20 }
 0x1ca   : >> { %662 = vadd.xlane.f32.xlu1 %v659_v22  ;;  %677 = vadd.xlane.f32.xlu0 %v676_v21  ;;  %v1186_v21 = vmov 0.0  }
 0x1ce   : >> { %660 = vadd.xlane.f32.xlu1 %v658_v23 }
 0x1d3   : >> { %v1069_v12 = vpop.eup %1068 }
 0x1d4   : >> { %v689_v14 = vmul.f32 0.6931472, %v1069_v12 }
 0x1d6   : >> { %v690_v19 = vsub.f32 0.0, %v689_v14 }
 0x247   : >> { %v620_v24 = vpop.xlane.xlu0 %619  ;;  %v618_v25 = vpop.xlane.xlu1 %617 }
 0x248   : >> { %v622_v26 = vcvt.f32.s32 %v620_v24  ;;  %v621_v27 = vcvt.f32.s32 %v618_v25  ;;  %v694_v24 = vld [vmem:[#allocation5] sm:$0x1] }
 0x24a   : >> { %v623_v28 = vshll.u32 %v622_v26, 16 }
 0x24b   : >> { %v642_v29 = vpop.xlane.xlu0 %641 }
 0x24c   : >> { %v624_v30 = vadd.s32 %v623_v28, %v621_v27  ;;  %v644_v31 = vcvt.f32.s32 %v642_v29  ;;  %v741_v29 = vld [vmem:[#allocation8] sm:$0x1] }
 0x24e   : >> { %v625_v32 = vrot.slane %v624_v30, 4  ;;  %v645_v33 = vshll.u32 %v644_v31, 16 }
 0x24f   : >> { %v640_v34 = vpop.xlane.xlu0 %639 }
 0x250   : >> { %v643_v35 = vcvt.f32.s32 %v640_v34  ;;  %v626_v36 = vadd.s32 %v625_v32, %v624_v30  ;;  %v716_v34 = vsub.f32 1.0, %v1377_v61 }
 0x252   : >> { %v646_v37 = vadd.s32 %v645_v33, %v643_v35  ;;  %v627_v39 = vrot.slane %v626_v36, 2  ;;  %v717_v35 = vsel %vm1397_vm13, %v716_v34, 1.0 }
 0x253   : >> { %v663_v40 = vpop.xlane.xlu1 %662  ;;  %v678_v41 = vpop.xlane.xlu0 %677 }
 0x254   : >> { %v647_v42 = vrot.slane %v646_v37, 4  ;;  %v665_v43 = vcvt.f32.s32 %v663_v40  ;;  %v628_v44 = vadd.s32 %v627_v39, %v626_v36  ;;  %v679_v45 = vrot.slane %v678_v41, 4 }
 0x256   : >> { %v648_v46 = vadd.s32 %v647_v42, %v646_v37  ;;  %v629_v47 = vrot.slane %v628_v44, 1  ;;  %v680_v48 = vadd.f32 %v679_v45, %v678_v41  ;;  %v666_v50 = vshll.u32 %v665_v43, 16  ;;  %v735_v41 = vld [vmem:[#allocation6] sm:$0x1] }
 0x257   : >> { %v661_v49 = vpop.xlane.xlu1 %660 }
 0x258   : >> { %v664_v51 = vcvt.f32.s32 %v661_v49  ;;  %v630_v52 = vadd.s32 %v629_v47, %v628_v44  ;;  %v649_v53 = vrot.slane %v648_v46, 2  ;;  %v681_v38 = vrot.slane %v680_v48, 2 }
 0x25a   : >> { %v667_v54 = vadd.s32 %v666_v50, %v664_v51  ;;  %968 = vpush %v630_v52  ;;  %v650_v56 = vadd.s32 %v649_v53, %v648_v46  ;;  %v682_v60 = vadd.f32 %v681_v38, %v680_v48 }
 0x25c   : >> { %v668_v58 = vrot.slane %v667_v54, 4  ;;  %v651_v59 = vrot.slane %v650_v56, 1  ;;  %v683_v2 = vrot.slane %v682_v60, 1 }
 0x25e   : >> { %v669_v62 = vadd.s32 %v668_v58, %v667_v54  ;;  %v652_v63 = vadd.s32 %v651_v59, %v650_v56  ;;  %v684_v6 = vadd.f32 %v683_v2, %v682_v60 }
 0x260   : >> { %970 = vpush %v652_v63  ;;  %v670_v0 = vrot.slane %v669_v62, 2 }
 0x262   : >> { %v671_v4 = vadd.s32 %v670_v0, %v669_v62 }
 0x264   : >> { %v672_v5 = vrot.slane %v671_v4, 1 }
 0x266   : >> { %v673_v7 = vadd.s32 %v672_v5, %v671_v4 }
 0x268   : >> { %972 = vpush %v673_v7 }
 0x269   : >> { %974 = vpush %v684_v6 }
 0x28b   : >> { %s1410_s25 = spop %968 }
 0x28c   : >> { %p632_p10 = scmp.gt.s32.totalorder %s1410_s25, 0 }
 0x28e   : >> { %p746_p11 = pnand %p745_p8, %p632_p10  ;;  %p1417_p12 = pnand %p632_p10, %p593_p9 }
 0x28f   : >> { %s752_s27 = scalar_select %p632_p10, 1, 0 }
 0x290   : >> { %s963_s28 = scalar_select %p746_p11, %s592_s13, %s1172_s21 }
 0x291   : >> { %v753_v13 = vstv %s752_s27  ;;  %s971_s26 = spop %970  ;;  %s581_s21 = sadd.s32 1, %s1172_s21  }
 0x292   : >> { %750 = sst [smem:[%s749_s30]] %s963_s28  ;;  %vm754_vm15 = vcmp.eq.s32.totalorder %v753_v13, 1  ;;  %p691_p13 = scmp.gt.s32.totalorder %s971_s26, 0 }
 0x293   : >> { %vm755_vm1 = vmand %vm751_vm14, %vm754_vm15  ;;  %s961_s9 = scalar_select %p1417_p12, 0, 1 }
 0x294   : >> { %v756_v16 = vsel %vm755_vm1, 0, %v1354_v55  ;;  %p692_p0 = pnand %p691_p13, %p632_p10  ;;  %p580_p6 = scmp.ge.s32.totalorder %s581_s21, %s1311_s18 }
 0x295   : >> { %757 = vst.msk [vmem:[#allocation4] sm:$0x1] %vm556_vm0, %v756_v16  ;;  %v710_v11 = vstv %s961_s9 }
 0x296   : >> { %s960_s10 = scalar_select %p692_p0, 0, 1  ;;  %vm711_vm2 = vcmp.eq.s32.totalorder %v710_v11, 1 }
 0x297   : >> { %vm712_vm5 = vmand %vm1361_vm4, %vm711_vm2 }
 0x298   : >> { %v698_v20 = vstv %s960_s10  ;;  %v713_v22 = vsel %vm712_vm5, 1.0, %v1186_v21 }
 0x299   : >> { %vm699_vm6 = vcmp.eq.s32.totalorder %v698_v20, 1  ;;  %s973_s11 = spop %972  ;;  %v714_v55 = vadd.f32 %v713_v22, %v706_v18 }
 0x29a   : >> { %p722_p3 = scmp.gt.s32.totalorder %s973_s11, 0  ;;  %p725_p4 = scmp.gt.s32.totalorder %s973_s11, 1  ;;  %vm700_vm7 = vmand %vm696_vm3, %vm699_vm6 }
 0x29b   : >> { %s975_s12 = spop %974  ;;  %v701_v23 = vsel %vm700_vm7, %v690_v19, 0.0  ;;  %715 = vst.msk [vmem:[#allocation7] sm:$0x1] %vm556_vm0, %v714_v55 }
 0x29c   : >> { %s1538_s11 = smov (!%p725_p4, %s973_s11), 1  ;;  %v702_v25 = vstv %s975_s12  ;;  %p723_p5 = pnand %p722_p3, %p632_p10 }
 0x29d   : >> { %v703_v26 = vmul.f32 %v702_v25, %v701_v23  ;;  %s727_s13 = scvt.s32.f32 %s1538_s11 }
 0x29e   : >> { %s962_s0 = scalar_select %p723_p5, 0, 1 }
 0x29f   : >> { %v704_v57 = vadd.f32 %v703_v26, %v694_v24  ;;  %v728_v27 = vstv %s727_s13 }
 0x2a0   : >> { %1070 = vrcp.f32 %v728_v27  ;;  %v732_v28 = vstv %s962_s0 }
 0x2a1   : >> { %705 = vst.msk [vmem:[#allocation5] sm:$0x1] %vm556_vm0, %v704_v57  ;;  %vm733_vm4 = vcmp.eq.s32.totalorder %v732_v28, 1  ;;  %1072 = vlog2.f32 %v717_v35 }
 0x2a2   : >> { %vm1444_vm8 = vmand %vm1397_vm13, %vm733_vm4 }
 0x2a3   : >> { %v742_v31 = vsel %vm1444_vm8, 1.0, %v1186_v21 }
 0x2a4   : >> { %v743_v32 = vadd.f32 %v742_v31, %v741_v29 }
 0x2a6   : >> { %744 = vst.msk [vmem:[#allocation8] sm:$0x1] %vm556_vm0, %v743_v32 }
 0x2ad   : >> { %v1071_v33 = vpop.eup %1070 }
 0x2ae   : >> { %976 = vpush %v1071_v33  ;;  %v1073_v36 = vpop.eup %1072 }
 0x2af   : >> { %v719_v37 = vmul.f32 0.6931472, %v1073_v36 }
 0x2b1   : >> { %v720_v39 = vsub.f32 0.0, %v719_v37 }
 0x2b3   : >> { %v721_v40 = vmul.f32 %v720_v39, %v1305_v1 }
 0x2b5   : >> { %v736_v42 = vsel %vm1444_vm8, %v721_v40, 0.0 }
 0x2df   : >> { %s977_s25 = spop %976 }
 0x2e0   : >> { %v737_v43 = vstv %s977_s25 }
 0x2e1   : >> { %v738_v44 = vmul.f32 %v737_v43, %v736_v42  ;;  %583 = sbr.rel (!%p580_p6) target bundleno = 438 (0x1b6), region = 112 }
 0x2e3   : >> { %v739_v45 = vadd.f32 %v738_v44, %v735_v41 }
 0x2e5   : >> { %740 = vst.msk [vmem:[#allocation6] sm:$0x1] %vm556_vm0, %v739_v45 }
 0x2e6 PF: > { %v780_v61 = vld [vmem:[#allocation7] sm:$0x1]  ;;  %v758_v15 = vld [vmem:[#allocation5] sm:$0x1]  ;;  %v791_v46 = vld [vmem:[#allocation8] sm:$0x1] }
 0x2e7   : > { %v781_v47 = vsel %vm556_vm0, %v780_v61, 0.0  ;;  %v759_v48 = vsel %vm556_vm0, %v758_v15, 0.0  ;;  %v792_v50 = vsel %vm556_vm0, %v791_v46, 0.0  ;;  %s964_s9 = sshll.u32 %s1260_s17, 4  ;;  %s832_s11 = sshll.u32 %s1346_s20, 4  ;;  %vm812_vm9 = vcmp.eq.s32.totalorder %v1321_v8, 0  ;;  %s833_s11 = int_to_ptr.vmem [resolvable:$true] %s832_s11 }
 0x2e8   : > { %782 = vadd.xlane.f32.xlu1 %v781_v47  ;;  %760 = vadd.xlane.f32.xlu0 %v759_v48  ;;  %s820_s17 = scalar_lea.sflag [#allocation14], %s315_s29 }
 0x2ec   : > { %v769_v49 = vld [vmem:[#allocation6] sm:$0x1]  ;;  %793 = vadd.xlane.f32.xlu1 %v792_v50 }
 0x2ed   : > { %v770_v51 = vsel %vm556_vm0, %v769_v49, 0.0  ;;  %vm813_vm0 = vcmp.eq.s32.totalorder %v1321_v8, 1 }
 0x2ee   : > { %771 = vadd.xlane.f32.xlu0 %v770_v51 }
 0x371   : > { %v783_v52 = vpop.xlane.xlu1 %782  ;;  %v761_v53 = vpop.xlane.xlu0 %760 }
 0x372   : > { %v784_v38 = vrot.slane %v783_v52, 4  ;;  %v762_v1 = vrot.slane %v761_v53, 4 }
 0x374   : > { %v785_v3 = vadd.f32 %v784_v38, %v783_v52  ;;  %v763_v54 = vadd.f32 %v762_v1, %v761_v53 }
 0x375   : > { %v794_v56 = vpop.xlane.xlu1 %793 }
 0x376   : > { %v786_v59 = vrot.slane %v785_v3, 2  ;;  %v764_v60 = vrot.slane %v763_v54, 2  ;;  %v795_v62 = vrot.slane %v794_v56, 4 }
 0x377   : > { %v772_v58 = vpop.xlane.xlu0 %771 }
 0x378   : > { %v773_v63 = vrot.slane %v772_v58, 4  ;;  %v796_v0 = vadd.f32 %v795_v62, %v794_v56  ;;  %v765_v4 = vadd.f32 %v764_v60, %v763_v54  ;;  %v787_v5 = vadd.f32 %v786_v59, %v785_v3 }
 0x37a   : > { %v774_v2 = vadd.f32 %v773_v63, %v772_v58  ;;  %v797_v6 = vrot.slane %v796_v0, 2  ;;  %v766_v9 = vrot.slane %v765_v4, 1  ;;  %v788_v14 = vrot.slane %v787_v5, 1 }
 0x37c   : > { %v775_v7 = vrot.slane %v774_v2, 2  ;;  %v798_v10 = vadd.f32 %v797_v6, %v796_v0  ;;  %v767_v13 = vadd.f32 %v766_v9, %v765_v4  ;;  %v789_v19 = vadd.f32 %v788_v14, %v787_v5 }
 0x37e   : > { %v776_v12 = vadd.f32 %v775_v7, %v774_v2  ;;  %978 = vpush %v767_v13  ;;  %v799_v17 = vrot.slane %v798_v10, 1 }
 0x380   : > { %v777_v16 = vrot.slane %v776_v12, 1  ;;  %v800_v18 = vadd.f32 %v799_v17, %v798_v10 }
 0x382   : > { %v778_v11 = vadd.f32 %v777_v16, %v776_v12 }
 0x384   : > { %980 = vpush %v778_v11 }
 0x385   : > { %982 = vpush %v789_v19 }
 0x386   : > { %984 = vpush %v800_v18 }
 0x3af   : > { %s979_s18 = spop %978 }
 0x3b5   : > { %s981_s21 = spop %980 }
 0x3b6   : > { %s983_s27 = spop %982 }
 0x3b7   : > { %s802_s28 = sadd.f32 1e-06, %s983_s27  ;;  %s985_s26 = spop %984 }
 0x3b8   : > { %s807_s30 = sadd.f32 1e-06, %s985_s26 }
 0x3b9   : > { %v803_v20 = vstv %s802_s28  ;;  %s1473_s28 = scalar_lea.hbm %s1518_s8, %s964_s9 }
 0x3ba   : > { %1074 = vrcp.f32 %v803_v20  ;;  %v808_v21 = vstv %s807_s30 }
 0x3bb   : > { %1076 = vrcp.f32 %v808_v21 }
 0x3c7   : > { %v1075_v22 = vpop.eup %1074 }
 0x3c8   : > { %v1077_v55 = vpop.eup %1076  ;;  %986 = vpush %v1075_v22 }
 0x3c9   : > { %988 = vpush %v1077_v55 }
 0x3f9   : > { %s987_s10 = spop %986 }
 0x3fa   : > { %s806_s12 = smul.f32 %s987_s10, %s979_s18  ;;  %s989_s13 = spop %988 }
 0x3fb   : > { %s811_s0 = smul.f32 %s989_s13, %s981_s21  ;;  %s1102_s18 = scalar_lea.vmem %s833_s11, 16 }
 0x3fc   : > { %v814_v23 = vstv %s806_s12  ;;  %p1103_p7 = scmp.ne.s32.totalorder %s833_s11, %s1102_s18  ;;  %s1187_s21 = smov [#allocation13]  }
 0x3fd   : > { %v815_v24 = vsel %vm813_vm0, %v814_v23, 0.0  ;;  %v816_v25 = vstv %s811_s0  ;;  %s1106_s26 = sshll.u32 %s1187_s21, 4  ;;  %s1107_s26 = int_to_ptr.vmem [resolvable:$false] %s1106_s26 }
 0x3fe   : > { %v817_v26 = vsel %vm812_vm9, %v816_v25, %v815_v24  ;;  %p1104_p8 = pnand %p1103_p7, %p1277_p1  ;;  %s1108_s30 = scalar_lea.vmem %s1107_s26, 32 }
 0x3ff   : > { %818 = vst [vmem:[%s1346_s20] sm:$0x1] %v817_v26  ;;  %p1109_p10 = scmp.lt.s32.totalorder %s833_s11, %s1107_s26  ;;  %p1110_p11 = scmp.lt.s32.totalorder %s1108_s30, %s1102_s18 }
 0x400   : > { %p1105_p9 = pneg %p1104_p8 }
 0x401   : > { %p1111_p12 = por %p1110_p11, %p1109_p10 }
 0x403   : > { %p1112_p13 = pnand %p1111_p12, %p1105_p9 }
 0x405   : > { %1115 = shalt.err (!%p1112_p13)
}
 0x406   : > { %s1116_s20 = scalar_lea.hbm %s1473_s28, 16  ;;  %s1120_s10 = scalar_lea.hbm %s1518_s8, 32 }
 0x407   : > { %p1117_p0 = scmp.ne.s32.totalorder %s1473_s28, %s1116_s20  ;;  %p1121_p5 = scmp.lt.s32.totalorder %s1473_s28, %s1518_s8 }
 0x408   : > { %p1122_p6 = scmp.lt.s32.totalorder %s1120_s10, %s1116_s20 }
 0x409   : > { %p1118_p3 = pnand %p1117_p0, %p1277_p1 }
 0x40a   : > { %p1123_p7 = por %p1122_p6, %p1121_p5 }
 0x40b   : > { %p1119_p4 = pneg %p1118_p3 }
 0x40d   : > { %p1124_p8 = pnand %p1123_p7, %p1119_p4 }
 0x40f   : > { %1127 = shalt.err (!%p1124_p8)
}
 0x410   : > { %990 = dma.vmem_to_hbm [thread:$0]  (%p1277_p1), %s833_s11, 16, %s1473_s28, %s820_s17  }
 0x411 PF: > { %p996_p9 = scmp.ge.s32.totalorder %s1168_s16, 2  ;;  %s844_s0 = sand.u32 1, %s1156_s1  }
 0x412   : > { %s845_s25 = scalar_lea.sflag [#allocation14], %s844_s0 }
 0x413   : > { %p993_p10 = pnand %p996_p9, %p1281_p2 }
 0x415   : > { %p994_p11 = pneg %p993_p10 }
 0x417   : > { %1151 = dma.done.wait (%p994_p11), %s845_s25, 16  }
 0x418   : > { %1153 = vsyncadd (%p994_p11), %s845_s25, 4294967280  ;;  %p28_p12 = scmp.ge.s32.totalorder %s1264_s19, 4   ;;  %s1533_s1 = smov %s1160_s14 }
 0x419   : > { %s1534_s14 = smov %s1164_s15  ;;  %s1535_s15 = smov %s1275_s22 }
 0x41a   : > { %s1536_s16 = smov %s1264_s19  ;;  %30 = sbr.rel (!%p28_p12) target bundleno = 28 (0x1c), region = 123 }
 0x41f   :  { %849 = vsyncpa [#allocation14], 1 }
 0x420   :  { %851 = vsyncpa [#allocation14 + $0x1], 1 }

</bundles_post_ra>
